<compile_context>
chip_gen: v7x
topology: tpu7x:2x2x1
jax: 0.10.0
libtpu: 0.0.40
codegen_flags: <defaults>
</compile_context>

<pallas_src>
import jax
import jax.numpy as jnp
from jax.experimental import pallas as pl
from jax.experimental.pallas import tpu as pltpu


def _round_up(n, m):
    return ((n + m - 1) // m) * m


def _pick_block_rows(batch, in_dim):
    """Adaptive batch-tile size (rows per grid step)."""
    target_x_bytes = 1 << 20                      # ~1 MiB of x per step
    tm = max(128, target_x_bytes // (4 * in_dim))
    # Rough live VMEM bytes per batch row: double-buffered f32 x + bf16 copy,
    # h1 (f32 + bf16) at width 128, h2/temps (f32) at width 64, small output.
    per_row_vmem = 10 * in_dim + 1600
    tm = min(tm, (24 << 20) // per_row_vmem)      # ~24 MiB budget: fits v5e/v6e/v7x
    tm = min(tm, 16384)
    tm = min(tm, _round_up(batch, 8))             # never exceed the batch
    if batch >= 4096:                             # keep >=2 steps for v7x megacore
        tm = min(tm, _round_up(pl.cdiv(batch, 2), 8))
    return max(8, _round_up(tm, 8))


def mlp_kernel(x_ref, w1_ref, b1_ref, w2_ref, b2_ref, w3r_ref, b3_ref, o_ref):
    # layer 1 + ReLU (MXU, bf16 operands, f32 accumulate)
    x = x_ref[...]
    if x.dtype != jnp.bfloat16:                   # skip cast if caller gave bf16
        x = x.astype(jnp.bfloat16)
    h1 = jnp.dot(x, w1_ref[...], preferred_element_type=jnp.float32)
    h1 = jnp.maximum(h1 + b1_ref[...], 0.0)

    # layer 2 + ReLU (MXU, bf16 operands, f32 accumulate)
    h2 = jnp.dot(h1.astype(jnp.bfloat16), w2_ref[...],
                 preferred_element_type=jnp.float32)
    h2 = jnp.maximum(h2 + b2_ref[...], 0.0)

    # layer 3 (64 -> 1): VPU multiply + XLU lane reduce (keep off the MXU).
    o_col = jnp.sum(h2 * w3r_ref[...], axis=-1, keepdims=True)     # (tm, 1) f32

    # Relayout to the lane-dense output block (8, tm//8); row-major flatten of
    # the (num_tiles*8, tm//8) output array preserves batch order.
    o_blk = o_col.reshape(o_ref.shape) + b3_ref[...]
    o_ref[...] = o_blk.astype(o_ref.dtype)


def leadership_potential_forward(x, params, *, block_rows=None):
    """x: (B, input_dim) float32 (or bfloat16) -> (B, 1) float32."""
    w1, b1, w2, b2, w3, b3 = params
    B, D = x.shape
    H2 = w2.shape[1]

    # Weights cast once to bf16 MXU operands; w3 kept f32 as a (1, 64) row so
    # layer 3 runs as a broadcast-multiply + lane reduction.
    w1b = w1.astype(jnp.bfloat16)
    w2b = w2.astype(jnp.bfloat16)
    w3r = w3.reshape(1, H2).astype(jnp.float32)
    b1r = b1.reshape(1, -1).astype(jnp.float32)
    b2r = b2.reshape(1, -1).astype(jnp.float32)
    b3r = b3.reshape(1, 1).astype(jnp.float32)

    if block_rows is None:
        tm = _pick_block_rows(B, D)
    else:
        tm = max(8, _round_up(min(block_rows, _round_up(B, 8)), 8))
    num_tiles = pl.cdiv(B, tm)                    # ragged last block is fine (no pad)

    def resident(arr):
        # Whole-array block, same tile every grid step -> stays in VMEM.
        return pl.BlockSpec(arr.shape, lambda i: (0, 0))

    # NOTE: if profiling shows the x DMA still exposed at large tm, add
    # pipeline_mode=pl.Buffered(3) to the x BlockSpec below.
    out = pl.pallas_call(
        mlp_kernel,
        out_shape=jax.ShapeDtypeStruct((num_tiles * 8, tm // 8), jnp.float32),
        grid=(num_tiles,),
        in_specs=[
            pl.BlockSpec((tm, D), lambda i: (i, 0)),   # x: batch-tiled
            resident(w1b), resident(b1r),
            resident(w2b), resident(b2r),
            resident(w3r), resident(b3r),
        ],
        out_specs=pl.BlockSpec((8, tm // 8), lambda i: (i, 0)),
        compiler_params=pltpu.CompilerParams(
            dimension_semantics=("parallel",),
            vmem_limit_bytes=40 * 1024 * 1024,
        ),
    )(x, w1b, b1r, w2b, b2r, w3r, b3r)

    # Rows past B (ragged last tile) hold unspecified values; slice them off.
    return out.reshape(-1)[:B].reshape(B, 1)


def init_params(key, input_dim):
    """Deterministic init mimicking PyTorch nn.Linear default
    (uniform +-1/sqrt(fan_in)).  Weights stored as (in_features, out_features)."""
    dims = [(input_dim, 128), (128, 64), (64, 1)]
    params = []
    for (fan_in, fan_out) in dims:
        key, kw, kb = jax.random.split(key, 3)
        bound = 1.0 / jnp.sqrt(fan_in)
        w = jax.random.uniform(kw, (fan_in, fan_out), jnp.float32, -bound, bound)
        b = jax.random.uniform(kb, (1, fan_out), jnp.float32, -bound, bound)
        params += [w, b]
    return tuple(params)


def reference_forward(x, params):
    """Pure-JAX reference using the same bf16-operand / f32-accumulate math."""
    w1, b1, w2, b2, w3, b3 = params
    h1 = jnp.dot(x.astype(jnp.bfloat16), w1.astype(jnp.bfloat16),
                 preferred_element_type=jnp.float32) + b1
    h1 = jnp.maximum(h1, 0.0)
    h2 = jnp.dot(h1.astype(jnp.bfloat16), w2.astype(jnp.bfloat16),
                 preferred_element_type=jnp.float32) + b2
    h2 = jnp.maximum(h2, 0.0)
    return jnp.sum(h2 * w3.reshape(1, -1), axis=-1, keepdims=True) + b3


if __name__ == "__main__":
    key = jax.random.PRNGKey(0)
    key, kx = jax.random.split(key)

    # Small, non-multiple-of-8 batch to exercise the ragged last tile.
    batch, input_dim = 203, 32
    x = jax.random.normal(kx, (batch, input_dim), dtype=jnp.float32)
    params = init_params(key, input_dim)

    ref = reference_forward(x, params)

    # Auto-tiled path (single grid step at this batch size).
    out_auto = jax.block_until_ready(leadership_potential_forward(x, params))
    # Forced small tile -> multi-step grid with VMEM-resident weights and a
    # ragged last block.
    out_tiled = jax.block_until_ready(
        leadership_potential_forward(x, params, block_rows=64))

    assert out_auto.shape == (batch, 1), out_auto.shape
    assert out_tiled.shape == (batch, 1), out_tiled.shape
    assert jnp.allclose(out_auto, ref, atol=1e-3, rtol=1e-3), "auto-tile mismatch"
    assert jnp.allclose(out_tiled, ref, atol=1e-3, rtol=1e-3), "forced-tile mismatch"

    print("KERNEL_OK")
</pallas_src>

<mosaic_0001>
module attributes {stable_mosaic.version = 11 : i64} {
  func.func @mlp_kernel(%arg0: i32, %arg1: memref<208x32xf32, #tpu.memory_space<vmem>>, %arg2: memref<32x128xbf16, #tpu.memory_space<vmem>>, %arg3: memref<1x128xf32, #tpu.memory_space<vmem>>, %arg4: memref<128x64xbf16, #tpu.memory_space<vmem>>, %arg5: memref<1x64xf32, #tpu.memory_space<vmem>>, %arg6: memref<1x64xf32, #tpu.memory_space<vmem>>, %arg7: memref<1x1xf32, #tpu.memory_space<vmem>>, %arg8: memref<8x26xf32, #tpu.memory_space<vmem>>) attributes {dimension_semantics = [#tpu.dimension_semantics<parallel>], iteration_bounds = array<i64: 1>, scalar_prefetch = 0 : i64, scratch_operands = 0 : i64, tpu.core_type = #tpu.core_type<tc>, window_params = [{transform_indices = @transform_0, window_bounds = array<i64: 208, 32>}, {pipeline_mode = #tpu.pipeline_mode<synchronous>, transform_indices = @transform_1, window_bounds = array<i64: 32, 128>}, {pipeline_mode = #tpu.pipeline_mode<synchronous>, transform_indices = @transform_2, window_bounds = array<i64: 1, 128>}, {pipeline_mode = #tpu.pipeline_mode<synchronous>, transform_indices = @transform_3, window_bounds = array<i64: 128, 64>}, {pipeline_mode = #tpu.pipeline_mode<synchronous>, transform_indices = @transform_4, window_bounds = array<i64: 1, 64>}, {pipeline_mode = #tpu.pipeline_mode<synchronous>, transform_indices = @transform_5, window_bounds = array<i64: 1, 64>}, {pipeline_mode = #tpu.pipeline_mode<synchronous>, transform_indices = @transform_6, window_bounds = array<i64: 1, 1>}, {transform_indices = @transform_7, window_bounds = array<i64: 8, 26>}]} {
    %c0 = arith.constant 0 : index
    %c0_0 = arith.constant 0 : index
    %0 = vector.load %arg1[%c0, %c0_0] : memref<208x32xf32, #tpu.memory_space<vmem>>, vector<208x32xf32>
    %1 = arith.truncf %0 : vector<208x32xf32> to vector<208x32xbf16>
    %c0_1 = arith.constant 0 : index
    %c0_2 = arith.constant 0 : index
    %2 = vector.load %arg2[%c0_1, %c0_2] : memref<32x128xbf16, #tpu.memory_space<vmem>>, vector<32x128xbf16>
    %cst = arith.constant dense<0.000000e+00> : vector<208x128xf32>
    %3 = tpu.matmul %1, %2, %cst {dimension_numbers = #tpu.dot_dimension_numbers<[1], [0], [0], [1], [0, 0, 1, 1], [], []>} : vector<208x32xbf16>, vector<32x128xbf16>, vector<208x128xf32> -> vector<208x128xf32>
    %c0_3 = arith.constant 0 : index
    %c0_4 = arith.constant 0 : index
    %4 = vector.load %arg3[%c0_3, %c0_4] : memref<1x128xf32, #tpu.memory_space<vmem>>, vector<1x128xf32>
    %5 = vector.broadcast %4 : vector<1x128xf32> to vector<208x128xf32>
    %6 = arith.addf %3, %5 : vector<208x128xf32>
    %cst_5 = arith.constant 0.000000e+00 : f32
    %7 = vector.broadcast %cst_5 : f32 to vector<208x128xf32>
    %8 = arith.maximumf %6, %7 : vector<208x128xf32>
    %9 = arith.truncf %8 : vector<208x128xf32> to vector<208x128xbf16>
    %c0_6 = arith.constant 0 : index
    %c0_7 = arith.constant 0 : index
    %10 = vector.load %arg4[%c0_6, %c0_7] : memref<128x64xbf16, #tpu.memory_space<vmem>>, vector<128x64xbf16>
    %cst_8 = arith.constant dense<0.000000e+00> : vector<208x64xf32>
    %11 = tpu.matmul %9, %10, %cst_8 {dimension_numbers = #tpu.dot_dimension_numbers<[1], [0], [0], [1], [0, 0, 1, 1], [], []>} : vector<208x128xbf16>, vector<128x64xbf16>, vector<208x64xf32> -> vector<208x64xf32>
    %c0_9 = arith.constant 0 : index
    %c0_10 = arith.constant 0 : index
    %12 = vector.load %arg5[%c0_9, %c0_10] : memref<1x64xf32, #tpu.memory_space<vmem>>, vector<1x64xf32>
    %13 = vector.broadcast %12 : vector<1x64xf32> to vector<208x64xf32>
    %14 = arith.addf %11, %13 : vector<208x64xf32>
    %cst_11 = arith.constant 0.000000e+00 : f32
    %15 = vector.broadcast %cst_11 : f32 to vector<208x64xf32>
    %16 = arith.maximumf %14, %15 : vector<208x64xf32>
    %c0_12 = arith.constant 0 : index
    %c0_13 = arith.constant 0 : index
    %17 = vector.load %arg6[%c0_12, %c0_13] : memref<1x64xf32, #tpu.memory_space<vmem>>, vector<1x64xf32>
    %18 = vector.broadcast %17 : vector<1x64xf32> to vector<208x64xf32>
    %19 = arith.mulf %16, %18 : vector<208x64xf32>
    %cst_14 = arith.constant dense<0.000000e+00> : vector<208xf32>
    %20 = vector.multi_reduction <add>, %19, %cst_14 [1] : vector<208x64xf32> to vector<208xf32>
    %21 = vector.shape_cast %20 : vector<208xf32> to vector<208x1xf32>
    %22 = vector.shape_cast %21 : vector<208x1xf32> to vector<8x26xf32>
    %c0_15 = arith.constant 0 : index
    %c0_16 = arith.constant 0 : index
    %23 = vector.load %arg7[%c0_15, %c0_16] : memref<1x1xf32, #tpu.memory_space<vmem>>, vector<1x1xf32>
    %24 = vector.broadcast %23 : vector<1x1xf32> to vector<8x26xf32>
    %25 = arith.addf %22, %24 : vector<8x26xf32>
    %c0_17 = arith.constant 0 : index
    %c0_18 = arith.constant 0 : index
    %26 = vector.load %arg8[%c0_17, %c0_18] : memref<8x26xf32, #tpu.memory_space<vmem>>, vector<8x26xf32>
    tpu.vector_store %arg8[%c0_17, %c0_18], %25 {strides = array<i32>} : memref<8x26xf32, #tpu.memory_space<vmem>>, vector<8x26xf32>,
    return
  }
  func.func @transform_0(%arg0: i32) -> (i32, i32) {
    %c0_i32 = arith.constant 0 : i32
    %c0_i32_0 = arith.constant 0 : i32
    return %arg0, %c0_i32 : i32, i32
  }
  func.func @transform_1(%arg0: i32) -> (i32, i32) {
    %c0_i32 = arith.constant 0 : i32
    %c0_i32_0 = arith.constant 0 : i32
    %c0_i32_1 = arith.constant 0 : i32
    return %c0_i32, %c0_i32_0 : i32, i32
  }
  func.func @transform_2(%arg0: i32) -> (i32, i32) {
    %c0_i32 = arith.constant 0 : i32
    %c0_i32_0 = arith.constant 0 : i32
    %c0_i32_1 = arith.constant 0 : i32
    return %c0_i32, %c0_i32_0 : i32, i32
  }
  func.func @transform_3(%arg0: i32) -> (i32, i32) {
    %c0_i32 = arith.constant 0 : i32
    %c0_i32_0 = arith.constant 0 : i32
    %c0_i32_1 = arith.constant 0 : i32
    return %c0_i32, %c0_i32_0 : i32, i32
  }
  func.func @transform_4(%arg0: i32) -> (i32, i32) {
    %c0_i32 = arith.constant 0 : i32
    %c0_i32_0 = arith.constant 0 : i32
    %c0_i32_1 = arith.constant 0 : i32
    return %c0_i32, %c0_i32_0 : i32, i32
  }
  func.func @transform_5(%arg0: i32) -> (i32, i32) {
    %c0_i32 = arith.constant 0 : i32
    %c0_i32_0 = arith.constant 0 : i32
    %c0_i32_1 = arith.constant 0 : i32
    return %c0_i32, %c0_i32_0 : i32, i32
  }
  func.func @transform_6(%arg0: i32) -> (i32, i32) {
    %c0_i32 = arith.constant 0 : i32
    %c0_i32_0 = arith.constant 0 : i32
    %c0_i32_1 = arith.constant 0 : i32
    return %c0_i32, %c0_i32_0 : i32, i32
  }
  func.func @transform_7(%arg0: i32) -> (i32, i32) {
    %c0_i32 = arith.constant 0 : i32
    %c0_i32_0 = arith.constant 0 : i32
    return %arg0, %c0_i32 : i32, i32
  }
}

</mosaic_0001>

<bundles_post_ra>
// kernel: tpu_custom_call.1
= control target key start
LH: loop header
LB: loop body
LE: loop exit
PB: predicated region body
PF: predicated region fallthrough
CT: control target
= control target key end

     0   :  { %s3920_s0 = inlined_call_operand.vmem [shape: f32[203,32], index: 0, kind: input, shape index: {}]   ;;  %s3921_s1 = inlined_call_operand.vmem [shape: bf16[32,128], index: 1, kind: input, shape index: {}]   ;;  %s3922_s2 = inlined_call_operand.vmem [shape: f32[1,128], index: 2, kind: input, shape index: {}]   ;;  %s3923_s3 = inlined_call_operand.vmem [shape: bf16[128,64], index: 3, kind: input, shape index: {}]   ;;  %s3924_s4 = inlined_call_operand.vmem [shape: f32[1,64], index: 4, kind: input, shape index: {}]   ;;  %s3925_s5 = inlined_call_operand.vmem [shape: f32[1,64], index: 5, kind: input, shape index: {}]   ;;  %s3926_s6 = inlined_call_operand.<no memory space> [shape: f32[1,1], index: 6, kind: input, shape index: {}]   ;;  %s3927_s7 = inlined_call_operand.hbm [shape: f32[8,26], index: 7, kind: output, shape index: {}]  }
   0x1   :  { %v12_v0 = vstv %s3926_s6 }
   0x2   :  { %13 = vst [vmem:[#allocation2] sm:$0x1] %v12_v0 }
   0x3   :  { %v2695_v1 = vld [vmem:[%s3921_s1] sm:$0xff]   ;;  %v2729_v2 = vmov 0.0   ;;  %v2696_v3 = vld [vmem:[%s3921_s1 + $0x8] sm:$0xff]   ;;  %vm2730_vm0 = vmmov 0   ;;  %vm92_vm1 = vcmask 261120   ;;  %v32_v7 = vld [vmem:[%s3920_s0 + $0x10] sm:$0xff] }
   0x4   :  { %2544 = vmatprep.subr.bf16.mxu0 %v2729_v2  ;;  %2668 = vmatprep.subr.bf16.mxu1 %v2729_v2  ;;  %v30_v4 = vld [vmem:[%s3920_s0] sm:$0xff]  ;;  %v31_v5 = vld [vmem:[%s3920_s0 + $0x8] sm:$0xff]  ;;  %v33_v8 = vld [vmem:[%s3920_s0 + $0x18] sm:$0xff] }
   0x5   :  { %2545 = vmatpush3.bf16.msra.mxu0 %v2695_v1  ;;  %2548 = vmatprep.mubr.msk.bf16.mxu0 %vm2730_vm0, %v2729_v2  ;;  %v56_v6 = vpack.c.bf16 %v31_v5, %v30_v4  ;;  %v2697_v9 = vld [vmem:[%s3923_s3] sm:$0xff]   ;;  %v57_v10 = vpack.c.bf16 %v33_v8, %v32_v7  ;;  %v2698_v11 = vld [vmem:[%s3923_s3 + $0x8] sm:$0xff]   ;;  %v2699_v14 = vld [vmem:[%s3923_s3 + $0x10] sm:$0xff]  }
   0x6   :  { %2546 = vmatprep.subr.bf16.mxu0 %v2729_v2  ;;  %2620 = vmatprep.mubr.msk.bf16.mxu1 %vm2730_vm0, %v2729_v2  ;;  %v34_v12 = vld [vmem:[%s3920_s0 + $0x20] sm:$0xff]  ;;  %v35_v13 = vld [vmem:[%s3920_s0 + $0x28] sm:$0xff] }
   0x7   :  { %2676 = vmatpush3.bf16.msra.mxu1 %v2697_v9 }
   0x8   :  { %2669 = vmatprep.subr.bf16.mxu1 %v2729_v2 }
   0x9   :  { %2547 = vmatpush3.bf16.msra.mxu0 %v2696_v3 }
   0xa   :  { %2600 = vmatprep.subr.bf16.mxu0 %v2729_v2 }
   0xb   :  { %2677 = vmatpush3.bf16.msra.mxu1 %v2698_v11 }
   0xc   :  { %2549 = vmatmul.mubr.msk.bf16.vlgmr.msra.gmra.mrb[0].mxu0 %vm92_vm1, %v56_v6 }
   0xd   :  { %2552 = vmatprep.mubr.msk.bf16.mxu0 %vm2730_vm0, %v2729_v2  ;;  %2601 = vmatpush3.bf16.msra.mxu0 %v2697_v9 }
   0xe   :  { %2602 = vmatprep.subr.bf16.mxu0 %v2729_v2 }
  0x11   :  { %2603 = vmatpush3.bf16.msra.mxu0 %v2698_v11 }
  0x14   :  { %2553 = vmatmul.mubr.msk.bf16.gmra.mrb[4].mxu0 %vm92_vm1, %v57_v10 }
  0x15   :  { %2556 = vmatprep.mubr.msk.bf16.mxu0 %vm2730_vm0, %v2729_v2 }
  0x16   :  { %14 = vsyncpa [#allocation4], 0  ;;  %2604 = vmatprep.subr.bf16.mxu0 %v2729_v2  ;;  %2670 = vmatprep.subr.bf16.mxu1 %v2729_v2  ;;  %v58_v15 = vpack.c.bf16 %v35_v13, %v34_v12  ;;  %v2700_v16 = vld [vmem:[%s3923_s3 + $0x18] sm:$0xff]   ;;  %v36_v17 = vld [vmem:[%s3920_s0 + $0x30] sm:$0xff]  ;;  %vm575_vm2 = vcmask 523264   ;;  %vm2301_vm3 = vcmask 130112  }
  0x17   :  { %2678 = vmatpush3.bf16.msra.mxu1 %v2699_v14  ;;  %2605 = vmatpush3.bf16.msra.mxu0 %v2699_v14  ;;  %v37_v18 = vld [vmem:[%s3920_s0 + $0x38] sm:$0xff]  ;;  %v2701_v19 = vld [vmem:[%s3923_s3 + $0x20] sm:$0xff]   ;;  %v2702_v21 = vld [vmem:[%s3923_s3 + $0x28] sm:$0xff]   ;;  %vm2308_vm4 = vcmask 195712   ;;  %vm2315_vm5 = vcmask 261312   ;;  %vm2450_vm6 = vcmask 1041409  }
  0x18   :  { %2671 = vmatprep.subr.bf16.mxu1 %v2729_v2  ;;  %2606 = vmatprep.subr.bf16.mxu0 %v2729_v2  ;;  %v59_v20 = vpack.c.bf16 %v37_v18, %v36_v17  ;;  %v38_v22 = vld [vmem:[%s3920_s0 + $0x40] sm:$0xff]  ;;  %v39_v23 = vld [vmem:[%s3920_s0 + $0x48] sm:$0xff]  ;;  %v40_v25 = vld [vmem:[%s3920_s0 + $0x50] sm:$0xff]  ;;  %vm2452_vm7 = vcmask 1042434   ;;  %vm2454_vm8 = vcmask 1043459   ;;  %vm2456_vm9 = vcmask 1044484  }
  0x19   :  { %v60_v24 = vpack.c.bf16 %v39_v23, %v38_v22  ;;  %v41_v26 = vld [vmem:[%s3920_s0 + $0x58] sm:$0xff]  ;;  %v42_v28 = vld [vmem:[%s3920_s0 + $0x60] sm:$0xff]  ;;  %v43_v29 = vld [vmem:[%s3920_s0 + $0x68] sm:$0xff]  ;;  %vm2458_vm10 = vcmask 1045509   ;;  %vm2460_vm11 = vcmask 1046534   ;;  %vm2462_vm12 = vcmask 1047559  }
  0x1a   :  { %v61_v27 = vpack.c.bf16 %v41_v26, %v40_v25  ;;  %v62_v30 = vpack.c.bf16 %v43_v29, %v42_v28  ;;  %v44_v31 = vld [vmem:[%s3920_s0 + $0x70] sm:$0xff]  ;;  %v45_v32 = vld [vmem:[%s3920_s0 + $0x78] sm:$0xff]  ;;  %v46_v34 = vld [vmem:[%s3920_s0 + $0x80] sm:$0xff]  ;;  %vm2465_vm13 = vcmask 211968  }
  0x1b   :  { %2679 = vmatpush3.bf16.msra.mxu1 %v2700_v16  ;;  %2607 = vmatpush3.bf16.msra.mxu0 %v2700_v16  ;;  %v63_v33 = vpack.c.bf16 %v45_v32, %v44_v31  ;;  %v47_v35 = vld [vmem:[%s3920_s0 + $0x88] sm:$0xff]  ;;  %v48_v37 = vld [vmem:[%s3920_s0 + $0x90] sm:$0xff]  ;;  %v49_v38 = vld [vmem:[%s3920_s0 + $0x98] sm:$0xff] }
  0x1c   :  { %2557 = vmatmul.mubr.msk.bf16.gmra.mrb[8].mxu0 %vm92_vm1, %v58_v15  ;;  %2608 = vmatprep.subr.bf16.mxu0 %v2729_v2  ;;  %v64_v36 = vpack.c.bf16 %v47_v35, %v46_v34  ;;  %v65_v39 = vpack.c.bf16 %v49_v38, %v48_v37  ;;  %v50_v40 = vld [vmem:[%s3920_s0 + $0xa0] sm:$0xff]  ;;  %v51_v41 = vld [vmem:[%s3920_s0 + $0xa8] sm:$0xff]  ;;  %v52_v43 = vld [vmem:[%s3920_s0 + $0xb0] sm:$0xff] }
  0x1d   :  { %2560 = vmatprep.mubr.msk.bf16.mxu0 %vm2730_vm0, %v2729_v2  ;;  %2672 = vmatprep.subr.bf16.mxu1 %v2729_v2  ;;  %v66_v42 = vpack.c.bf16 %v51_v41, %v50_v40  ;;  %v53_v44 = vld [vmem:[%s3920_s0 + $0xb8] sm:$0xff]  ;;  %v2703_v45 = vld [vmem:[%s3923_s3 + $0x30] sm:$0xff]   ;;  %v54_v48 = vld [vmem:[%s3920_s0 + $0xc0] sm:$0xff] }
  0x1e   :  { %v67_v46 = vpack.c.bf16 %v53_v44, %v52_v43  ;;  %v2704_v47 = vld [vmem:[%s3923_s3 + $0x38] sm:$0xff]   ;;  %v55_v49 = vld [vmem:[%s3920_s0 + $0xc8] sm:$0xff]  ;;  %v2953_v51 = vld [vmem:[%s3922_s2] ss:$0 sm:$0xff] }
  0x1f   :  { %2680 = vmatpush3.bf16.msra.mxu1 %v2701_v19  ;;  %2609 = vmatpush3.bf16.msra.mxu0 %v2701_v19  ;;  %v68_v50 = vpack.c.bf16 %v55_v49, %v54_v48 }
  0x20   :  { %2673 = vmatprep.subr.bf16.mxu1 %v2729_v2  ;;  %2610 = vmatprep.subr.bf16.mxu0 %v2729_v2 }
  0x23   :  { %2681 = vmatpush3.bf16.msra.mxu1 %v2702_v21  ;;  %2611 = vmatpush3.bf16.msra.mxu0 %v2702_v21 }
  0x24   :  { %2561 = vmatmul.mubr.msk.bf16.gmra.mrb[12].mxu0 %vm92_vm1, %v59_v20  ;;  %2612 = vmatprep.subr.bf16.mxu0 %v2729_v2 }
  0x25   :  { %2564 = vmatprep.mubr.msk.bf16.mxu0 %vm2730_vm0, %v2729_v2  ;;  %2674 = vmatprep.subr.bf16.mxu1 %v2729_v2 }
  0x27   :  { %2613 = vmatpush3.bf16.msra.mxu0 %v2703_v45  ;;  %2682 = vmatpush3.bf16.msra.mxu1 %v2703_v45 }
  0x28   :  { %2614 = vmatprep.subr.bf16.mxu0 %v2729_v2  ;;  %2675 = vmatprep.subr.bf16.mxu1 %v2729_v2 }
  0x2b   :  { %2615 = vmatpush3.bf16.msra.mxu0 %v2704_v47  ;;  %2683 = vmatpush3.bf16.msra.mxu1 %v2704_v47 }
  0x2c   :  { %2565 = vmatmul.mubr.msk.bf16.gmra.mrb[16].mxu0 %vm92_vm1, %v60_v24 }
  0x2d   :  { %2568 = vmatprep.mubr.msk.bf16.mxu0 %vm2730_vm0, %v2729_v2 }
  0x34   :  { %2569 = vmatmul.mubr.msk.bf16.gmra.mrb[20].mxu0 %vm92_vm1, %v61_v27 }
  0x35   :  { %2572 = vmatprep.mubr.msk.bf16.mxu0 %vm2730_vm0, %v2729_v2 }
  0x3c   :  { %2573 = vmatmul.mubr.msk.bf16.gmra.mrb[24].mxu0 %vm92_vm1, %v62_v30 }
  0x3d   :  { %2576 = vmatprep.mubr.msk.bf16.mxu0 %vm2730_vm0, %v2729_v2 }
  0x44   :  { %2577 = vmatmul.mubr.msk.bf16.gmra.mrb[28].mxu0 %vm92_vm1, %v63_v33 }
  0x45   :  { %2580 = vmatprep.mubr.msk.bf16.mxu0 %vm2730_vm0, %v2729_v2 }
  0x4c   :  { %2581 = vmatmul.mubr.msk.bf16.gmra.mrb[32].mxu0 %vm92_vm1, %v64_v36 }
  0x4d   :  { %2584 = vmatprep.mubr.msk.bf16.mxu0 %vm2730_vm0, %v2729_v2 }
  0x54   :  { %2585 = vmatmul.mubr.msk.bf16.gmra.mrb[36].mxu0 %vm92_vm1, %v65_v39 }
  0x55   :  { %2588 = vmatprep.mubr.msk.bf16.mxu0 %vm2730_vm0, %v2729_v2 }
  0x5c   :  { %2589 = vmatmul.mubr.msk.bf16.gmra.mrb[40].mxu0 %vm92_vm1, %v66_v42 }
  0x5d   :  { %2592 = vmatprep.mubr.msk.bf16.mxu0 %vm2730_vm0, %v2729_v2 }
  0x64   :  { %2593 = vmatmul.mubr.msk.bf16.gmra.mrb[44].mxu0 %vm92_vm1, %v67_v46 }
  0x65   :  { %2596 = vmatprep.mubr.msk.bf16.mxu0 %vm2730_vm0, %v2729_v2 }
  0x6c   :  { %2597 = vmatmul.mubr.msk.bf16.gmra.mrb[48].mxu0 %vm92_vm1, %v68_v50 }
  0x6d   :  { %2616 = vmatprep.mubr.msk.bf16.mxu0 %vm2730_vm0, %v2729_v2 }
  0xdf   :  { %v166_v52 = vpop.f32.mrb[0].mxu0 }
  0xe0   :  { %v167_v53 = vadd.f32 %v2953_v51, %v166_v52  ;;  %v2550_v54 = vpop.f32.mrb[1].mxu0 }
  0xe1   :  { %v169_v55 = vpop.f32.mrb[2].mxu0 }
  0xe2   :  { %v170_v56 = vadd.f32 %v2953_v51, %v169_v55  ;;  %v2551_v57 = vpop.f32.mrb[3].mxu0  ;;  %v269_v58 = vmax.f32 %v167_v53, 0.0 }
  0xe4   :  { %v270_v59 = vmax.f32 %v170_v56, 0.0 }
  0xe6   :  { %v295_v60 = vpack.c.bf16 %v270_v59, %v269_v58 }
  0xe7   :  { %v174_v61 = vpop.f32.mrb[4].mxu0 }
  0xe8   :  { %v175_v62 = vadd.f32 %v2953_v51, %v174_v61  ;;  %v2554_v63 = vpop.f32.mrb[5].mxu0  ;;  %2617 = vmatmul.mubr.bf16.vlgmr.msra.gmra.mrb[52].mxu0 %v295_v60 }
  0xe9   :  { %v177_v0 = vpop.f32.mrb[6].mxu0 }
  0xea   :  { %v178_v1 = vadd.f32 %v2953_v51, %v177_v0  ;;  %v2555_v3 = vpop.f32.mrb[7].mxu0  ;;  %v271_v4 = vmax.f32 %v175_v62, 0.0 }
  0xec   :  { %v272_v5 = vmax.f32 %v178_v1, 0.0 }
  0xee   :  { %v296_v6 = vpack.c.bf16 %v272_v5, %v271_v4 }
  0xef   :  { %v182_v7 = vpop.f32.mrb[8].mxu0 }
  0xf0   :  { %v183_v8 = vadd.f32 %v2953_v51, %v182_v7  ;;  %v2558_v9 = vpop.f32.mrb[9].mxu0  ;;  %2621 = vmatmul.mubr.bf16.vlgmr.msra.gmra.mrb[0].mxu1 %v296_v6 }
  0xf1   :  { %v185_v10 = vpop.f32.mrb[10].mxu0  ;;  %2624 = vmatprep.mubr.msk.bf16.mxu1 %vm2730_vm0, %v2729_v2 }
  0xf2   :  { %v186_v11 = vadd.f32 %v2953_v51, %v185_v10  ;;  %v2559_v12 = vpop.f32.mrb[11].mxu0  ;;  %v273_v13 = vmax.f32 %v183_v8, 0.0 }
  0xf4   :  { %v274_v14 = vmax.f32 %v186_v11, 0.0 }
  0xf6   :  { %v297_v15 = vpack.c.bf16 %v274_v14, %v273_v13 }
  0xf7   :  { %v190_v16 = vpop.f32.mrb[12].mxu0 }
  0xf8   :  { %v191_v17 = vadd.f32 %v2953_v51, %v190_v16  ;;  %v2562_v18 = vpop.f32.mrb[13].mxu0  ;;  %2625 = vmatmul.mubr.bf16.gmra.mrb[4].mxu1 %v297_v15 }
  0xf9   :  { %v193_v19 = vpop.f32.mrb[14].mxu0  ;;  %2628 = vmatprep.mubr.msk.bf16.mxu1 %vm2730_vm0, %v2729_v2 }
  0xfa   :  { %v194_v20 = vadd.f32 %v2953_v51, %v193_v19  ;;  %v2563_v21 = vpop.f32.mrb[15].mxu0  ;;  %v275_v22 = vmax.f32 %v191_v17, 0.0 }
  0xfc   :  { %v276_v23 = vmax.f32 %v194_v20, 0.0 }
  0xfe   :  { %v298_v24 = vpack.c.bf16 %v276_v23, %v275_v22 }
  0xff   :  { %v198_v25 = vpop.f32.mrb[16].mxu0 }
 0x100   :  { %v199_v26 = vadd.f32 %v2953_v51, %v198_v25  ;;  %v2566_v27 = vpop.f32.mrb[17].mxu0  ;;  %2629 = vmatmul.mubr.bf16.gmra.mrb[8].mxu1 %v298_v24 }
 0x101   :  { %v201_v28 = vpop.f32.mrb[18].mxu0  ;;  %2632 = vmatprep.mubr.msk.bf16.mxu1 %vm2730_vm0, %v2729_v2 }
 0x102   :  { %v202_v29 = vadd.f32 %v2953_v51, %v201_v28  ;;  %v2567_v30 = vpop.f32.mrb[19].mxu0  ;;  %v277_v31 = vmax.f32 %v199_v26, 0.0 }
 0x104   :  { %v278_v32 = vmax.f32 %v202_v29, 0.0 }
 0x106   :  { %v299_v33 = vpack.c.bf16 %v278_v32, %v277_v31 }
 0x107   :  { %v206_v34 = vpop.f32.mrb[20].mxu0 }
 0x108   :  { %v207_v35 = vadd.f32 %v2953_v51, %v206_v34  ;;  %v2570_v36 = vpop.f32.mrb[21].mxu0  ;;  %2633 = vmatmul.mubr.bf16.gmra.mrb[12].mxu1 %v299_v33 }
 0x109   :  { %v209_v37 = vpop.f32.mrb[22].mxu0  ;;  %2636 = vmatprep.mubr.msk.bf16.mxu1 %vm2730_vm0, %v2729_v2 }
 0x10a   :  { %v210_v38 = vadd.f32 %v2953_v51, %v209_v37  ;;  %v2571_v39 = vpop.f32.mrb[23].mxu0  ;;  %v279_v40 = vmax.f32 %v207_v35, 0.0 }
 0x10c   :  { %v280_v41 = vmax.f32 %v210_v38, 0.0 }
 0x10e   :  { %v300_v42 = vpack.c.bf16 %v280_v41, %v279_v40 }
 0x10f   :  { %v214_v43 = vpop.f32.mrb[24].mxu0 }
 0x110   :  { %v215_v44 = vadd.f32 %v2953_v51, %v214_v43  ;;  %v2574_v45 = vpop.f32.mrb[25].mxu0  ;;  %2637 = vmatmul.mubr.bf16.gmra.mrb[16].mxu1 %v300_v42 }
 0x111   :  { %v217_v46 = vpop.f32.mrb[26].mxu0  ;;  %2640 = vmatprep.mubr.msk.bf16.mxu1 %vm2730_vm0, %v2729_v2  ;;  %v3006_v45 = vld [vmem:[%s3924_s4] ss:$0 sm:$0xff]  ;;  %s2737_s4 = smov [#allocation3]  }
 0x112   :  { %v218_v47 = vadd.f32 %v2953_v51, %v217_v46  ;;  %v2575_v48 = vpop.f32.mrb[27].mxu0  ;;  %v281_v49 = vmax.f32 %v215_v44, 0.0  ;;  %v2731_v44 = vmov 0  }
 0x113   :  { %2693 = vset.pattern.permute.xlu0 %v2731_v44  ;;  %2694 = vset.pattern.permute.xlu1 %v2731_v44 }
 0x114   :  { %v282_v50 = vmax.f32 %v218_v47, 0.0 }
 0x116   :  { %v301_v52 = vpack.c.bf16 %v282_v50, %v281_v49 }
 0x117   :  { %v222_v53 = vpop.f32.mrb[28].mxu0 }
 0x118   :  { %v223_v54 = vadd.f32 %v2953_v51, %v222_v53  ;;  %v2578_v55 = vpop.f32.mrb[29].mxu0  ;;  %2641 = vmatmul.mubr.bf16.gmra.mrb[20].mxu1 %v301_v52 }
 0x119   :  { %v225_v56 = vpop.f32.mrb[30].mxu0  ;;  %2644 = vmatprep.mubr.msk.bf16.mxu1 %vm2730_vm0, %v2729_v2 }
 0x11a   :  { %v226_v57 = vadd.f32 %v2953_v51, %v225_v56  ;;  %v2579_v58 = vpop.f32.mrb[31].mxu0  ;;  %v283_v59 = vmax.f32 %v223_v54, 0.0 }
 0x11c   :  { %v284_v60 = vmax.f32 %v226_v57, 0.0 }
 0x11e   :  { %v302_v61 = vpack.c.bf16 %v284_v60, %v283_v59 }
 0x11f   :  { %v230_v62 = vpop.f32.mrb[32].mxu0 }
 0x120   :  { %v231_v63 = vadd.f32 %v2953_v51, %v230_v62  ;;  %v2582_v0 = vpop.f32.mrb[33].mxu0  ;;  %2645 = vmatmul.mubr.bf16.gmra.mrb[24].mxu1 %v302_v61 }
 0x121   :  { %v233_v1 = vpop.f32.mrb[34].mxu0  ;;  %2648 = vmatprep.mubr.msk.bf16.mxu1 %vm2730_vm0, %v2729_v2 }
 0x122   :  { %v234_v3 = vadd.f32 %v2953_v51, %v233_v1  ;;  %v2583_v4 = vpop.f32.mrb[35].mxu0  ;;  %v285_v5 = vmax.f32 %v231_v63, 0.0 }
 0x124   :  { %v286_v6 = vmax.f32 %v234_v3, 0.0 }
 0x126   :  { %v303_v7 = vpack.c.bf16 %v286_v6, %v285_v5 }
 0x127   :  { %v238_v8 = vpop.f32.mrb[36].mxu0 }
 0x128   :  { %v239_v9 = vadd.f32 %v2953_v51, %v238_v8  ;;  %v2586_v10 = vpop.f32.mrb[37].mxu0  ;;  %2649 = vmatmul.mubr.bf16.gmra.mrb[28].mxu1 %v303_v7 }
 0x129   :  { %v241_v11 = vpop.f32.mrb[38].mxu0  ;;  %2652 = vmatprep.mubr.msk.bf16.mxu1 %vm2730_vm0, %v2729_v2 }
 0x12a   :  { %v242_v12 = vadd.f32 %v2953_v51, %v241_v11  ;;  %v2587_v13 = vpop.f32.mrb[39].mxu0  ;;  %v287_v14 = vmax.f32 %v239_v9, 0.0 }
 0x12c   :  { %v288_v15 = vmax.f32 %v242_v12, 0.0 }
 0x12e   :  { %v304_v16 = vpack.c.bf16 %v288_v15, %v287_v14 }
 0x12f   :  { %v246_v17 = vpop.f32.mrb[40].mxu0 }
 0x130   :  { %v247_v18 = vadd.f32 %v2953_v51, %v246_v17  ;;  %v2590_v19 = vpop.f32.mrb[41].mxu0  ;;  %2653 = vmatmul.mubr.bf16.gmra.mrb[32].mxu1 %v304_v16 }
 0x131   :  { %v249_v20 = vpop.f32.mrb[42].mxu0  ;;  %2656 = vmatprep.mubr.msk.bf16.mxu1 %vm2730_vm0, %v2729_v2 }
 0x132   :  { %v250_v21 = vadd.f32 %v2953_v51, %v249_v20  ;;  %v2591_v22 = vpop.f32.mrb[43].mxu0  ;;  %v289_v23 = vmax.f32 %v247_v18, 0.0 }
 0x134   :  { %v290_v24 = vmax.f32 %v250_v21, 0.0 }
 0x136   :  { %v305_v25 = vpack.c.bf16 %v290_v24, %v289_v23 }
 0x137   :  { %v254_v26 = vpop.f32.mrb[44].mxu0 }
 0x138   :  { %v255_v27 = vadd.f32 %v2953_v51, %v254_v26  ;;  %v2594_v28 = vpop.f32.mrb[45].mxu0  ;;  %2657 = vmatmul.mubr.bf16.gmra.mrb[36].mxu1 %v305_v25 }
 0x139   :  { %v257_v29 = vpop.f32.mrb[46].mxu0  ;;  %2660 = vmatprep.mubr.msk.bf16.mxu1 %vm2730_vm0, %v2729_v2 }
 0x13a   :  { %v258_v30 = vadd.f32 %v2953_v51, %v257_v29  ;;  %v2595_v31 = vpop.f32.mrb[47].mxu0  ;;  %v291_v32 = vmax.f32 %v255_v27, 0.0 }
 0x13c   :  { %v292_v33 = vmax.f32 %v258_v30, 0.0 }
 0x13e   :  { %v306_v34 = vpack.c.bf16 %v292_v33, %v291_v32 }
 0x13f   :  { %v262_v35 = vpop.f32.mrb[48].mxu0 }
 0x140   :  { %v263_v36 = vadd.f32 %v2953_v51, %v262_v35  ;;  %v2598_v37 = vpop.f32.mrb[49].mxu0  ;;  %2661 = vmatmul.mubr.bf16.gmra.mrb[40].mxu1 %v306_v34 }
 0x141   :  { %v265_v38 = vpop.f32.mrb[50].mxu0  ;;  %2664 = vmatprep.mubr.msk.bf16.mxu1 %vm2730_vm0, %v2729_v2 }
 0x142   :  { %v266_v39 = vadd.f32 %v2953_v51, %v265_v38  ;;  %v2599_v40 = vpop.f32.mrb[51].mxu0  ;;  %v293_v41 = vmax.f32 %v263_v36, 0.0  ;;  %v3012_v51 = vld [vmem:[%s3925_s5] ss:$0 sm:$0xff]  ;;  %s2473_s5 = sshll.u32 %s2737_s4, 4  ;;  %s2474_s5 = int_to_ptr.vmem [resolvable:$true] %s2473_s5 }
 0x143   :  { %s2705_s26 = scalar_lea.vmem %s2474_s5, 128  ;;  %p2710_p1 = scmp.lt.s32.totalorder %s2474_s5, %s2474_s5 }
 0x144   :  { %v294_v42 = vmax.f32 %v266_v39, 0.0  ;;  %p2706_p0 = scmp.ne.s32.totalorder %s2474_s5, %s2705_s26  ;;  %p2711_p2 = scmp.lt.s32.totalorder %s2705_s26, %s2705_s26 }
 0x146   :  { %v307_v43 = vpack.c.bf16 %v294_v42, %v293_v41  ;;  %p2712_p3 = por %p2711_p2, %p2710_p1 }
 0x148   :  { %2665 = vmatmul.mubr.bf16.gmra.mrb[44].mxu1 %v307_v43  ;;  %p2713_p4 = pnand %p2712_p3, %p2706_p0 }
 0x1bb   :  { %v413_v46 = vpop.f32.mrb[52].mxu0 }
 0x1bc   :  { %v414_v47 = vadd.f32 %v3006_v45, %v413_v46  ;;  %v2618_v48 = vpop.f32.mrb[53].mxu0 }
 0x1bd   :  { %v416_v2 = vpop.f32.mrb[54].mxu0 }
 0x1be   :  { %v516_v49 = vmax.f32 %v414_v47, 0.0  ;;  %v417_v50 = vadd.f32 %v3006_v45, %v416_v2  ;;  %v2619_v52 = vpop.f32.mrb[55].mxu0 }
 0x1c0   :  { %v517_v53 = vmax.f32 %v417_v50, 0.0  ;;  %v549_v54 = vmul.f32 %v3012_v51, %v516_v49 }
 0x1c2   :  { %v576_v55 = vsel %vm575_vm2, %v549_v54, 0.0  ;;  %v550_v56 = vmul.f32 %v3012_v51, %v517_v53 }
 0x1c3   :  { %v421_v57 = vpop.f32.mrb[0].mxu1  ;;  %577 = vadd.xlane.f32.xlu0 %v576_v55 }
 0x1c4   :  { %v422_v58 = vadd.f32 %v3006_v45, %v421_v57  ;;  %v2622_v59 = vpop.f32.mrb[1].mxu1  ;;  %v579_v0 = vsel %vm575_vm2, %v550_v56, 0.0 }
 0x1c5   :  { %v424_v60 = vpop.f32.mrb[2].mxu1 }
 0x1c6   :  { %v518_v61 = vmax.f32 %v422_v58, 0.0  ;;  %v425_v62 = vadd.f32 %v3006_v45, %v424_v60  ;;  %v2623_v63 = vpop.f32.mrb[3].mxu1 }
 0x1c7   :  { %580 = vadd.xlane.f32.xlu0 %v579_v0 }
 0x1c8   :  { %v519_v1 = vmax.f32 %v425_v62, 0.0  ;;  %v551_v3 = vmul.f32 %v3012_v51, %v518_v61 }
 0x1ca   :  { %v582_v4 = vsel %vm575_vm2, %v551_v3, 0.0  ;;  %v552_v5 = vmul.f32 %v3012_v51, %v519_v1 }
 0x1cb   :  { %583 = vadd.xlane.f32.xlu1 %v582_v4  ;;  %v429_v6 = vpop.f32.mrb[4].mxu1 }
 0x1cc   :  { %v430_v7 = vadd.f32 %v3006_v45, %v429_v6  ;;  %v2626_v8 = vpop.f32.mrb[5].mxu1  ;;  %v585_v13 = vsel %vm575_vm2, %v552_v5, 0.0 }
 0x1cd   :  { %v432_v9 = vpop.f32.mrb[6].mxu1 }
 0x1ce   :  { %v520_v10 = vmax.f32 %v430_v7, 0.0  ;;  %v433_v11 = vadd.f32 %v3006_v45, %v432_v9  ;;  %v2627_v12 = vpop.f32.mrb[7].mxu1 }
 0x1cf   :  { %586 = vadd.xlane.f32.xlu1 %v585_v13 }
 0x1d0   :  { %v521_v14 = vmax.f32 %v433_v11, 0.0  ;;  %v553_v15 = vmul.f32 %v3012_v51, %v520_v10 }
 0x1d2   :  { %v588_v16 = vsel %vm575_vm2, %v553_v15, 0.0  ;;  %v554_v17 = vmul.f32 %v3012_v51, %v521_v14 }
 0x1d3   :  { %v437_v18 = vpop.f32.mrb[8].mxu1  ;;  %589 = vadd.xlane.f32.xlu0 %v588_v16 }
 0x1d4   :  { %v438_v19 = vadd.f32 %v3006_v45, %v437_v18  ;;  %v2630_v20 = vpop.f32.mrb[9].mxu1  ;;  %v591_v21 = vsel %vm575_vm2, %v554_v17, 0.0 }
 0x1d5   :  { %592 = vadd.xlane.f32.xlu1 %v591_v21  ;;  %v440_v22 = vpop.f32.mrb[10].mxu1 }
 0x1d6   :  { %v522_v23 = vmax.f32 %v438_v19, 0.0  ;;  %v441_v24 = vadd.f32 %v3006_v45, %v440_v22  ;;  %v2631_v25 = vpop.f32.mrb[11].mxu1 }
 0x1d8   :  { %v523_v26 = vmax.f32 %v441_v24, 0.0  ;;  %v555_v27 = vmul.f32 %v3012_v51, %v522_v23 }
 0x1da   :  { %v594_v28 = vsel %vm575_vm2, %v555_v27, 0.0  ;;  %v556_v29 = vmul.f32 %v3012_v51, %v523_v26 }
 0x1db   :  { %v445_v30 = vpop.f32.mrb[12].mxu1  ;;  %595 = vadd.xlane.f32.xlu0 %v594_v28 }
 0x1dc   :  { %v446_v31 = vadd.f32 %v3006_v45, %v445_v30  ;;  %v2634_v32 = vpop.f32.mrb[13].mxu1  ;;  %v597_v33 = vsel %vm575_vm2, %v556_v29, 0.0 }
 0x1dd   :  { %598 = vadd.xlane.f32.xlu1 %v597_v33  ;;  %v448_v34 = vpop.f32.mrb[14].mxu1 }
 0x1de   :  { %v524_v35 = vmax.f32 %v446_v31, 0.0  ;;  %v449_v36 = vadd.f32 %v3006_v45, %v448_v34  ;;  %v2635_v37 = vpop.f32.mrb[15].mxu1 }
 0x1e0   :  { %v525_v38 = vmax.f32 %v449_v36, 0.0  ;;  %v557_v39 = vmul.f32 %v3012_v51, %v524_v35 }
 0x1e2   :  { %v600_v40 = vsel %vm575_vm2, %v557_v39, 0.0  ;;  %v558_v41 = vmul.f32 %v3012_v51, %v525_v38 }
 0x1e3   :  { %v453_v42 = vpop.f32.mrb[16].mxu1  ;;  %601 = vadd.xlane.f32.xlu0 %v600_v40 }
 0x1e4   :  { %v454_v43 = vadd.f32 %v3006_v45, %v453_v42  ;;  %v2638_v44 = vpop.f32.mrb[17].mxu1  ;;  %v603_v46 = vsel %vm575_vm2, %v558_v41, 0.0 }
 0x1e5   :  { %604 = vadd.xlane.f32.xlu1 %v603_v46  ;;  %v456_v47 = vpop.f32.mrb[18].mxu1 }
 0x1e6   :  { %v526_v48 = vmax.f32 %v454_v43, 0.0  ;;  %v457_v2 = vadd.f32 %v3006_v45, %v456_v47  ;;  %v2639_v49 = vpop.f32.mrb[19].mxu1 }
 0x1e8   :  { %v527_v50 = vmax.f32 %v457_v2, 0.0  ;;  %v559_v52 = vmul.f32 %v3012_v51, %v526_v48 }
 0x1ea   :  { %v606_v53 = vsel %vm575_vm2, %v559_v52, 0.0  ;;  %v560_v54 = vmul.f32 %v3012_v51, %v527_v50 }
 0x1eb   :  { %v461_v55 = vpop.f32.mrb[20].mxu1  ;;  %607 = vadd.xlane.f32.xlu0 %v606_v53 }
 0x1ec   :  { %v462_v56 = vadd.f32 %v3006_v45, %v461_v55  ;;  %v2642_v57 = vpop.f32.mrb[21].mxu1  ;;  %v609_v58 = vsel %vm575_vm2, %v560_v54, 0.0 }
 0x1ed   :  { %610 = vadd.xlane.f32.xlu1 %v609_v58  ;;  %v464_v59 = vpop.f32.mrb[22].mxu1 }
 0x1ee   :  { %v528_v60 = vmax.f32 %v462_v56, 0.0  ;;  %v465_v61 = vadd.f32 %v3006_v45, %v464_v59  ;;  %v2643_v62 = vpop.f32.mrb[23].mxu1 }
 0x1f0   :  { %v529_v63 = vmax.f32 %v465_v61, 0.0  ;;  %v561_v0 = vmul.f32 %v3012_v51, %v528_v60 }
 0x1f2   :  { %v612_v1 = vsel %vm575_vm2, %v561_v0, 0.0  ;;  %v562_v3 = vmul.f32 %v3012_v51, %v529_v63 }
 0x1f3   :  { %v469_v4 = vpop.f32.mrb[24].mxu1  ;;  %613 = vadd.xlane.f32.xlu0 %v612_v1 }
 0x1f4   :  { %v470_v5 = vadd.f32 %v3006_v45, %v469_v4  ;;  %v2646_v6 = vpop.f32.mrb[25].mxu1  ;;  %v615_v7 = vsel %vm575_vm2, %v562_v3, 0.0 }
 0x1f5   :  { %616 = vadd.xlane.f32.xlu1 %v615_v7  ;;  %v472_v8 = vpop.f32.mrb[26].mxu1 }
 0x1f6   :  { %v530_v9 = vmax.f32 %v470_v5, 0.0  ;;  %v473_v10 = vadd.f32 %v3006_v45, %v472_v8  ;;  %v2647_v11 = vpop.f32.mrb[27].mxu1 }
 0x1f8   :  { %v531_v12 = vmax.f32 %v473_v10, 0.0  ;;  %v563_v13 = vmul.f32 %v3012_v51, %v530_v9 }
 0x1fa   :  { %v618_v14 = vsel %vm575_vm2, %v563_v13, 0.0  ;;  %v564_v15 = vmul.f32 %v3012_v51, %v531_v12 }
 0x1fb   :  { %v477_v16 = vpop.f32.mrb[28].mxu1  ;;  %619 = vadd.xlane.f32.xlu0 %v618_v14 }
 0x1fc   :  { %v478_v17 = vadd.f32 %v3006_v45, %v477_v16  ;;  %v2650_v18 = vpop.f32.mrb[29].mxu1  ;;  %v621_v19 = vsel %vm575_vm2, %v564_v15, 0.0  ;;  %v2507_v15 = vld [vmem:[#allocation2] ss:$0 sm:$0xff] }
 0x1fd   :  { %622 = vadd.xlane.f32.xlu1 %v621_v19  ;;  %v480_v20 = vpop.f32.mrb[30].mxu1 }
 0x1fe   :  { %v532_v21 = vmax.f32 %v478_v17, 0.0  ;;  %v481_v22 = vadd.f32 %v3006_v45, %v480_v20  ;;  %v2651_v23 = vpop.f32.mrb[31].mxu1 }
 0x1ff   :  { %v2732_v23 = vmov 269488144  }
 0x200   :  { %v533_v24 = vmax.f32 %v481_v22, 0.0  ;;  %v565_v25 = vmul.f32 %v3012_v51, %v532_v21 }
 0x202   :  { %v624_v26 = vsel %vm575_vm2, %v565_v25, 0.0  ;;  %v566_v27 = vmul.f32 %v3012_v51, %v533_v24  ;;  %v681_v24 = vunpack.c.l.s4 %v2732_v23  ;;  %v3928_v25 = vlaneseq }
 0x203   :  { %v485_v28 = vpop.f32.mrb[32].mxu1  ;;  %625 = vadd.xlane.f32.xlu0 %v624_v26 }
 0x204   :  { %v486_v29 = vadd.f32 %v3006_v45, %v485_v28  ;;  %v2654_v30 = vpop.f32.mrb[33].mxu1  ;;  %v627_v31 = vsel %vm575_vm2, %v566_v27, 0.0  ;;  %v2733_v27 = vmov 842150450  }
 0x205   :  { %628 = vadd.xlane.f32.xlu1 %v627_v31  ;;  %v488_v32 = vpop.f32.mrb[34].mxu1  ;;  %v688_v28 = vunpack.c.l.s4 %v2733_v27  ;;  %v2735_v31 = vmov 1987475062  }
 0x206   :  { %v534_v33 = vmax.f32 %v486_v29, 0.0  ;;  %v489_v34 = vadd.f32 %v3006_v45, %v488_v32  ;;  %v2655_v35 = vpop.f32.mrb[35].mxu1  ;;  %v2734_v29 = vmov 1414812756   ;;  %v702_v32 = vunpack.c.l.s4 %v2735_v31 }
 0x207   :  { %v695_v30 = vunpack.c.l.s4 %v2734_v29  ;;  %v3114_v35 = vshrl.u32 %v3928_v25, 7 }
 0x208   :  { %v535_v36 = vmax.f32 %v489_v34, 0.0  ;;  %v567_v37 = vmul.f32 %v3012_v51, %v534_v33  ;;  %v682_v34 = vunpack.c.0.s8 %v681_v24 }
 0x20a   :  { %v630_v38 = vsel %vm575_vm2, %v567_v37, 0.0  ;;  %v568_v39 = vmul.f32 %v3012_v51, %v535_v36  ;;  %v2736_v37 = vmov 1983009808  }
 0x20b   :  { %v493_v40 = vpop.f32.mrb[36].mxu1  ;;  %631 = vadd.xlane.f32.xlu0 %v630_v38  ;;  %v1733_v38 = vunpack.c.l.s4 %v2736_v37 }
 0x20c   :  { %v494_v41 = vadd.f32 %v3006_v45, %v493_v40  ;;  %v2658_v42 = vpop.f32.mrb[37].mxu1  ;;  %v633_v43 = vsel %vm575_vm2, %v568_v39, 0.0  ;;  %v689_v39 = vunpack.c.0.s8 %v688_v28  ;;  %v696_v40 = vunpack.c.0.s8 %v695_v30 }
 0x20d   :  { %634 = vadd.xlane.f32.xlu1 %v633_v43  ;;  %v496_v44 = vpop.f32.mrb[38].mxu1  ;;  %v3121_v43 = vsub.s32 %v682_v34, %v3114_v35 }
 0x20e   :  { %v536_v46 = vmax.f32 %v494_v41, 0.0  ;;  %v497_v47 = vadd.f32 %v3006_v45, %v496_v44  ;;  %v2659_v48 = vpop.f32.mrb[39].mxu1  ;;  %v703_v41 = vunpack.c.0.s8 %v702_v32 }
 0x20f   :  { %v3129_v48 = vsub.s32 %v696_v40, %v3114_v35 }
 0x210   :  { %v537_v2 = vmax.f32 %v497_v47, 0.0  ;;  %v569_v49 = vmul.f32 %v3012_v51, %v536_v46  ;;  %v1734_v46 = vunpack.c.0.s8 %v1733_v38  ;;  %v3126_v47 = vsub.s32 %v689_v39, %v3114_v35 }
 0x212   :  { %v636_v50 = vsel %vm575_vm2, %v569_v49, 0.0  ;;  %v570_v52 = vmul.f32 %v3012_v51, %v537_v2  ;;  %v3132_v2 = vsub.s32 %v703_v41, %v3114_v35 }
 0x213   :  { %v501_v53 = vpop.f32.mrb[40].mxu1  ;;  %637 = vadd.xlane.f32.xlu0 %v636_v50 }
 0x214   :  { %v502_v54 = vadd.f32 %v3006_v45, %v501_v53  ;;  %v2662_v55 = vpop.f32.mrb[41].mxu1  ;;  %v639_v56 = vsel %vm575_vm2, %v570_v52, 0.0  ;;  %v3141_v53 = vsub.s32 %v1734_v46, %v3114_v35 }
 0x215   :  { %640 = vadd.xlane.f32.xlu1 %v639_v56  ;;  %v504_v57 = vpop.f32.mrb[42].mxu1 }
 0x216   :  { %v538_v58 = vmax.f32 %v502_v54, 0.0  ;;  %v505_v59 = vadd.f32 %v3006_v45, %v504_v57  ;;  %v2663_v60 = vpop.f32.mrb[43].mxu1 }
 0x218   :  { %v539_v61 = vmax.f32 %v505_v59, 0.0  ;;  %v571_v62 = vmul.f32 %v3012_v51, %v538_v58 }
 0x21a   :  { %v642_v63 = vsel %vm575_vm2, %v571_v62, 0.0  ;;  %v572_v0 = vmul.f32 %v3012_v51, %v539_v61 }
 0x21b   :  { %v509_v1 = vpop.f32.mrb[44].mxu1  ;;  %643 = vadd.xlane.f32.xlu0 %v642_v63 }
 0x21c   :  { %v510_v3 = vadd.f32 %v3006_v45, %v509_v1  ;;  %v2666_v4 = vpop.f32.mrb[45].mxu1  ;;  %v645_v5 = vsel %vm575_vm2, %v572_v0, 0.0 }
 0x21d   :  { %646 = vadd.xlane.f32.xlu1 %v645_v5  ;;  %v512_v6 = vpop.f32.mrb[46].mxu1 }
 0x21e   :  { %v540_v7 = vmax.f32 %v510_v3, 0.0  ;;  %v513_v8 = vadd.f32 %v3006_v45, %v512_v6  ;;  %v2667_v9 = vpop.f32.mrb[47].mxu1 }
 0x220   :  { %v541_v10 = vmax.f32 %v513_v8, 0.0  ;;  %v573_v11 = vmul.f32 %v3012_v51, %v540_v7 }
 0x222   :  { %v648_v12 = vsel %vm575_vm2, %v573_v11, 0.0  ;;  %v574_v13 = vmul.f32 %v3012_v51, %v541_v10 }
 0x223   :  { %649 = vadd.xlane.f32.xlu0 %v648_v12 }
 0x224   :  { %v651_v14 = vsel %vm575_vm2, %v574_v13, 0.0 }
 0x225   :  { %652 = vadd.xlane.f32.xlu1 %v651_v14 }
 0x239   :  { %1519 = vperm.xlu0 %2693, %v2507_v15  }
 0x250   :  { %v3091_v16 = vpop.xlane.xlu0 %577 }
 0x251   :  { %v686_v50 = vrot.slane %v3091_v16, %v3121_v43  ;;  %v693_v54 = vrot.slane %v3091_v16, %v3126_v47  ;;  %v700_v55 = vrot.slane %v3091_v16, %v3129_v48  ;;  %v707_v56 = vrot.slane %v3091_v16, %v3132_v2 }
 0x254   :  { %v3095_v18 = vpop.xlane.xlu0 %580 }
 0x255   :  { %v714_v57 = vrot.slane %v3095_v18, %v3121_v43  ;;  %v721_v58 = vrot.slane %v3095_v18, %v3126_v47  ;;  %v728_v59 = vrot.slane %v3095_v18, %v3129_v48  ;;  %v735_v60 = vrot.slane %v3095_v18, %v3132_v2 }
 0x258   :  { %v3093_v17 = vpop.xlane.xlu1 %583 }
 0x25c   :  { %v3097_v45 = vpop.xlane.xlu1 %586 }
 0x25d   :  { %v770_v1 = vrot.slane %v3097_v45, %v3121_v43 }
 0x260   :  { %v3099_v19 = vpop.xlane.xlu0 %589 }
 0x262   :  { %v3101_v20 = vpop.xlane.xlu1 %592 }
 0x268   :  { %v3103_v21 = vpop.xlane.xlu0 %595 }
 0x269   :  { %v868_v27 = vrot.slane %v3103_v21, %v3129_v48  ;;  %v875_v28 = vrot.slane %v3103_v21, %v3132_v2 }
 0x26a   :  { %v3105_v51 = vpop.xlane.xlu1 %598 }
 0x26b   :  { %v882_v29 = vrot.slane %v3105_v51, %v3121_v43  ;;  %v889_v31 = vrot.slane %v3105_v51, %v3126_v47 }
 0x270   :  { %v3107_v22 = vpop.xlane.xlu0 %601 }
 0x271   :  { %v924_v40 = vrot.slane %v3107_v22, %v3129_v48  ;;  %v931_v41 = vrot.slane %v3107_v22, %v3132_v2 }
 0x272   :  { %v3109_v26 = vpop.xlane.xlu1 %604 }
 0x273   :  { %v938_v46 = vrot.slane %v3109_v26, %v3121_v43  ;;  %v945_v25 = vrot.slane %v3109_v26, %v3126_v47  ;;  %v959_v34 = vrot.slane %v3109_v26, %v3132_v2 }
 0x278   :  { %v3111_v33 = vpop.xlane.xlu0 %607 }
 0x279   :  { %v966_v39 = vrot.slane %v3111_v33, %v3121_v43  ;;  %v973_v32 = vrot.slane %v3111_v33, %v3126_v47  ;;  %v980_v23 = vrot.slane %v3111_v33, %v3129_v48 }
 0x27a   :  { %v3116_v36 = vpop.xlane.xlu1 %610 }
 0x27b   :  { %v1015_v12 = vrot.slane %v3116_v36, %v3132_v2 }
 0x280   :  { %v3118_v42 = vpop.xlane.xlu0 %613 }
 0x281   :  { %v1022_v11 = vrot.slane %v3118_v42, %v3121_v43 }
 0x282   :  { %v3123_v44 = vpop.xlane.xlu1 %616 }
 0x288   :  { %v3134_v49 = vpop.xlane.xlu0 %619 }
 0x28a   :  { %v3138_v52 = vpop.xlane.xlu1 %622 }
 0x290   :  { %v3167_v3 = vpop.xlane.xlu0 %625 }
 0x292   :  { %v3177_v8 = vpop.xlane.xlu1 %628 }
 0x298   :  { %v3203_v30 = vpop.xlane.xlu0 %631 }
 0x29a   :  { %v3213_v38 = vpop.xlane.xlu1 %634 }
 0x2a0   :  { %v3239_v13 = vpop.xlane.xlu0 %637 }
 0x2a2   :  { %v3249_v10 = vpop.xlane.xlu1 %640 }
 0x2a8   :  { %v3275_v0 = vpop.xlane.xlu0 %643 }
 0x2aa   :  { %v3285_v5 = vpop.xlane.xlu1 %646 }
 0x2b0   :  { %v3311_v62 = vpop.xlane.xlu0 %649 }
 0x2b2   :  { %v3321_v37 = vpop.xlane.xlu1 %652 }
 0x2b8   :  { %v3347_v14 = vpop.permute.xlu0 %1519 }
 0x2b9   :  { %v1548_v61 = vadd.f32 %v3347_v14, %v868_v27  ;;  %v1549_v4 = vadd.f32 %v3347_v14, %v875_v28  ;;  %v1550_v24 = vadd.f32 %v3347_v14, %v882_v29  ;;  %v1551_v9 = vadd.f32 %v3347_v14, %v889_v31 }
 0x2ba   :  { %v1522_v27 = vadd.f32 %v3347_v14, %v686_v50  ;;  %v1523_v28 = vadd.f32 %v3347_v14, %v693_v54  ;;  %v1524_v29 = vadd.f32 %v3347_v14, %v700_v55  ;;  %v1525_v31 = vadd.f32 %v3347_v14, %v707_v56 }
 0x2bb   :  { %v1846_v63 = vcombine.low %v1548_v61, %v1549_v4  ;;  %v1847_v7 = vcombine.low %v1550_v24, %v1551_v9  ;;  %v1556_v50 = vadd.f32 %v3347_v14, %v924_v40  ;;  %v1557_v54 = vadd.f32 %v3347_v14, %v931_v41 }
 0x2bc   :  { %v1730_v6 = vcombine.low %v1522_v27, %v1523_v28  ;;  %v1731_v15 = vcombine.low %v1524_v29, %v1525_v31  ;;  %v1558_v16 = vadd.f32 %v3347_v14, %v938_v46  ;;  %v1559_v55 = vadd.f32 %v3347_v14, %v945_v25 }
 0x2bd   :  { %v1854_v56 = vrot.slane %v1846_v63, %v3141_v53  ;;  %v1861_v61 = vrot.slane %v1847_v7, %v3141_v53  ;;  %v1880_v4 = vcombine.low %v1556_v50, %v1557_v54  ;;  %v1526_v9 = vadd.f32 %v3347_v14, %v714_v57 }
 0x2be   :  { %v1738_v24 = vrot.slane %v1730_v6, %v3141_v53  ;;  %v1745_v40 = vrot.slane %v1731_v15, %v3141_v53  ;;  %v1881_v41 = vcombine.low %v1558_v16, %v1559_v55  ;;  %v1527_v25 = vadd.f32 %v3347_v14, %v721_v58 }
 0x2bf   :  { %v1862_v46 = vcombine.low %v1854_v56, %v1861_v61  ;;  %v1888_v63 = vrot.slane %v1880_v4, %v3141_v53  ;;  %v1528_v7 = vadd.f32 %v3347_v14, %v728_v59  ;;  %v1529_v57 = vadd.f32 %v3347_v14, %v735_v60 }
 0x2c0   :  { %v1746_v6 = vcombine.low %v1738_v24, %v1745_v40  ;;  %v1895_v15 = vrot.slane %v1881_v41, %v3141_v53  ;;  %v1747_v27 = vcombine.low %v1526_v9, %v1527_v25  ;;  %v1561_v58 = vadd.f32 %v3347_v14, %v959_v34 }
 0x2c1   :  { %2219 = vperm.xlu0 %2693, %v1862_v46   ;;  %v1748_v28 = vcombine.low %v1528_v7, %v1529_v57  ;;  %v1562_v59 = vadd.f32 %v3347_v14, %v966_v39  ;;  %v1563_v18 = vadd.f32 %v3347_v14, %v973_v32  ;;  %v1564_v60 = vadd.f32 %v3347_v14, %v980_v23 }
 0x2c2   :  { %2195 = vperm.xlu1 %2694, %v1746_v6   ;;  %v1896_v29 = vcombine.low %v1888_v63, %v1895_v15  ;;  %v1755_v34 = vrot.slane %v1747_v27, %v3141_v53  ;;  %v1534_v31 = vadd.f32 %v3347_v14, %v770_v1  ;;  %v1569_v39 = vadd.f32 %v3347_v14, %v1015_v12 }
 0x2c3   :  { %v1762_v32 = vrot.slane %v1748_v28, %v3141_v53  ;;  %v1904_v50 = vcombine.low %v1561_v58, %v1562_v59  ;;  %v1905_v54 = vcombine.low %v1563_v18, %v1564_v60  ;;  %v1570_v23 = vadd.f32 %v3347_v14, %v1022_v11 }
 0x2c4   :  { %v1787_v16 = vrot.slane %v1534_v31, %v3141_v53  ;;  %v3929_v55 = vrot.slane %v3118_v42, %v3126_v47  ;;  %v3930_v56 = vrot.slane %v3118_v42, %v3129_v48  ;;  %v3931_v61 = vrot.slane %v3093_v17, %v3121_v43 }
 0x2c5   :  { %2225 = vperm.xlu0 %2693, %v1896_v29   ;;  %v1763_v9 = vcombine.low %v1755_v34, %v1762_v32  ;;  %v1912_v11 = vrot.slane %v1904_v50, %v3141_v53  ;;  %v1919_v24 = vrot.slane %v1905_v54, %v3141_v53  ;;  %v1938_v40 = vcombine.low %v1569_v39, %v1570_v23 }
 0x2c6   :  { %v1571_v1 = vadd.f32 %v3347_v14, %v3929_v55  ;;  %v1572_v12 = vadd.f32 %v3347_v14, %v3930_v56  ;;  %v1530_v4 = vadd.f32 %v3347_v14, %v3931_v61  ;;  %v3932_v25 = vrot.slane %v3093_v17, %v3126_v47 }
 0x2c7   :  { %v3933_v63 = vrot.slane %v3093_v17, %v3129_v48  ;;  %v3934_v57 = vrot.slane %v3093_v17, %v3132_v2  ;;  %2198 = vperm.xlu1 %2694, %v1763_v9   ;;  %v1920_v15 = vcombine.low %v1912_v11, %v1919_v24  ;;  %v1946_v27 = vrot.slane %v1938_v40, %v3141_v53 }
 0x2c8   :  { %v1939_v41 = vcombine.low %v1571_v1, %v1572_v12  ;;  %v1531_v46 = vadd.f32 %v3347_v14, %v3932_v25  ;;  %v3935_v58 = vrot.slane %v3134_v49, %v3121_v43  ;;  %v3936_v59 = vrot.slane %v3134_v49, %v3126_v47 }
 0x2c9   :  { %v1532_v7 = vadd.f32 %v3347_v14, %v3933_v63  ;;  %v1533_v6 = vadd.f32 %v3347_v14, %v3934_v57  ;;  %v3937_v34 = vrot.slane %v3134_v49, %v3129_v48  ;;  %2231 = vperm.xlu0 %2693, %v1920_v15   ;;  %v3938_v39 = vrot.slane %v3134_v49, %v3132_v2 }
 0x2ca   :  { %v1578_v28 = vadd.f32 %v3347_v14, %v3935_v58  ;;  %v1579_v18 = vadd.f32 %v3347_v14, %v3936_v59  ;;  %v1953_v60 = vrot.slane %v1939_v41, %v3141_v53  ;;  %v1764_v29 = vcombine.low %v1530_v4, %v1531_v46 }
 0x2cb   :  { %v1765_v17 = vcombine.low %v1532_v7, %v1533_v6  ;;  %v1580_v31 = vadd.f32 %v3347_v14, %v3937_v34  ;;  %v1581_v32 = vadd.f32 %v3347_v14, %v3938_v39  ;;  %v3939_v54 = vrot.slane %v3097_v45, %v3126_v47  ;;  %2204 = vperm.xlu1 %2694, %v1787_v16  }
 0x2cc   :  { %v1979_v50 = vcombine.low %v1578_v28, %v1579_v18  ;;  %v3940_v55 = vrot.slane %v3097_v45, %v3129_v48  ;;  %v1954_v56 = vcombine.low %v1946_v27, %v1953_v60  ;;  %v1772_v12 = vrot.slane %v1764_v29, %v3141_v53 }
 0x2cd   :  { %v1535_v23 = vadd.f32 %v3347_v14, %v3939_v54  ;;  %v1779_v61 = vrot.slane %v1765_v17, %v3141_v53  ;;  %v3941_v49 = vrot.slane %v3097_v45, %v3132_v2  ;;  %v1980_v9 = vcombine.low %v1580_v31, %v1581_v32 }
 0x2ce   :  { %v1536_v1 = vadd.f32 %v3347_v14, %v3940_v55  ;;  %v1987_v11 = vrot.slane %v1979_v50, %v3141_v53  ;;  %v3942_v24 = vrot.slane %v3099_v19, %v3121_v43  ;;  %v3943_v46 = vrot.slane %v3138_v52, %v3121_v43  ;;  %2237 = vperm.xlu0 %2693, %v1954_v56  }
 0x2cf   :  { %v1537_v4 = vadd.f32 %v3347_v14, %v3941_v49  ;;  %v1780_v25 = vcombine.low %v1772_v12, %v1779_v61  ;;  %v3944_v45 = vrot.slane %v3138_v52, %v3126_v47  ;;  %v3945_v7 = vrot.slane %v3138_v52, %v3129_v48 }
 0x2d0   :  { %v1538_v40 = vadd.f32 %v3347_v14, %v3942_v24  ;;  %v1788_v41 = vcombine.low %v1535_v23, %v1536_v1  ;;  %v1582_v63 = vadd.f32 %v3347_v14, %v3943_v46  ;;  %v1994_v6 = vrot.slane %v1980_v9, %v3141_v53 }
 0x2d1   :  { %v1583_v16 = vadd.f32 %v3347_v14, %v3944_v45  ;;  %v1584_v57 = vadd.f32 %v3347_v14, %v3945_v7  ;;  %v3946_v58 = vrot.slane %v3138_v52, %v3132_v2  ;;  %v3947_v18 = vrot.slane %v3099_v19, %v3126_v47  ;;  %2201 = vperm.xlu1 %2694, %v1780_v25  }
 0x2d2   :  { %v1789_v15 = vcombine.low %v1537_v4, %v1538_v40  ;;  %v1796_v27 = vrot.slane %v1788_v41, %v3141_v53  ;;  %v3948_v29 = vrot.slane %v3099_v19, %v3129_v48  ;;  %v3949_v34 = vrot.slane %v3099_v19, %v3132_v2 }
 0x2d3   :  { %v1585_v28 = vadd.f32 %v3347_v14, %v3946_v58  ;;  %v1996_v59 = vcombine.low %v1582_v63, %v1583_v16  ;;  %v1539_v60 = vadd.f32 %v3347_v14, %v3947_v18  ;;  %v1995_v52 = vcombine.low %v1987_v11, %v1994_v6 }
 0x2d4   :  { %v1540_v17 = vadd.f32 %v3347_v14, %v3948_v29  ;;  %v1541_v31 = vadd.f32 %v3347_v14, %v3949_v34  ;;  %v1803_v39 = vrot.slane %v1789_v15, %v3141_v53  ;;  %v3950_v50 = vrot.slane %v3101_v20, %v3121_v43 }
 0x2d5   :  { %v1997_v32 = vcombine.low %v1584_v57, %v1585_v28  ;;  %v2004_v23 = vrot.slane %v1996_v59, %v3141_v53  ;;  %v3951_v1 = vrot.slane %v3177_v8, %v3126_v47  ;;  %v3952_v56 = vrot.slane %v3177_v8, %v3129_v48  ;;  %2246 = vperm.xlu0 %2693, %v1995_v52  }
 0x2d6   :  { %v1542_v54 = vadd.f32 %v3347_v14, %v3950_v50  ;;  %v1805_v55 = vcombine.low %v1539_v60, %v1540_v17  ;;  %v1804_v61 = vcombine.low %v1796_v27, %v1803_v39  ;;  %v3953_v9 = vrot.slane %v3177_v8, %v3132_v2 }
 0x2d7   :  { %v1591_v19 = vadd.f32 %v3347_v14, %v3951_v1  ;;  %v1592_v12 = vadd.f32 %v3347_v14, %v3952_v56  ;;  %v2011_v49 = vrot.slane %v1997_v32, %v3141_v53  ;;  %v3954_v40 = vrot.slane %v3203_v30, %v3121_v43 }
 0x2d8   :  { %v1806_v4 = vcombine.low %v1541_v31, %v1542_v54  ;;  %v1593_v11 = vadd.f32 %v3347_v14, %v3953_v9  ;;  %v1813_v24 = vrot.slane %v1805_v55, %v3141_v53  ;;  %v3955_v46 = vrot.slane %v3103_v21, %v3126_v47  ;;  %2207 = vperm.xlu1 %2694, %v1804_v61  }
 0x2d9   :  { %v1594_v41 = vadd.f32 %v3347_v14, %v3954_v40  ;;  %v2037_v25 = vcombine.low %v1591_v19, %v1592_v12  ;;  %v2012_v45 = vcombine.low %v2004_v23, %v2011_v49  ;;  %v3956_v7 = vrot.slane %v3203_v30, %v3126_v47 }
 0x2da   :  { %v1547_v63 = vadd.f32 %v3347_v14, %v3955_v46  ;;  %v1820_v16 = vrot.slane %v1806_v4, %v3141_v53  ;;  %v3957_v6 = vrot.slane %v3203_v30, %v3129_v48  ;;  %v3958_v59 = vrot.slane %v3203_v30, %v3132_v2 }
 0x2db   :  { %v1595_v57 = vadd.f32 %v3347_v14, %v3956_v7  ;;  %v2038_v27 = vcombine.low %v1593_v11, %v1594_v41  ;;  %v2045_v58 = vrot.slane %v2037_v25, %v3141_v53  ;;  %2249 = vperm.xlu0 %2693, %v2012_v45   ;;  %v3959_v29 = vrot.slane %v3213_v38, %v3121_v43 }
 0x2dc   :  { %v1596_v15 = vadd.f32 %v3347_v14, %v3957_v6  ;;  %v1845_v28 = vrot.slane %v1547_v63, %v3141_v53  ;;  %v1597_v18 = vadd.f32 %v3347_v14, %v3958_v59  ;;  %v1821_v60 = vcombine.low %v1813_v24, %v1820_v16 }
 0x2dd   :  { %v1598_v17 = vadd.f32 %v3347_v14, %v3959_v29  ;;  %v3960_v31 = vrot.slane %v3101_v20, %v3126_v47  ;;  %v2052_v39 = vrot.slane %v2038_v27, %v3141_v53  ;;  %v3961_v30 = vrot.slane %v3101_v20, %v3129_v48 }
 0x2de   :  { %v2054_v34 = vcombine.low %v1595_v57, %v1596_v15  ;;  %v3962_v50 = vrot.slane %v3101_v20, %v3132_v2  ;;  %v3963_v23 = vrot.slane %v3103_v21, %v3121_v43  ;;  %2210 = vperm.xlu1 %2694, %v1821_v60   ;;  %v3964_v56 = vrot.slane %v3239_v13, %v3129_v48 }
 0x2df   :  { %v1543_v52 = vadd.f32 %v3347_v14, %v3960_v31  ;;  %v1544_v32 = vadd.f32 %v3347_v14, %v3961_v30  ;;  %v2055_v1 = vcombine.low %v1597_v18, %v1598_v17  ;;  %v3965_v61 = vrot.slane %v3239_v13, %v3132_v2 }
 0x2e0   :  { %v1545_v54 = vadd.f32 %v3347_v14, %v3962_v50  ;;  %v1546_v55 = vadd.f32 %v3347_v14, %v3963_v23  ;;  %v2062_v19 = vrot.slane %v2054_v34, %v3141_v53  ;;  %v1604_v12 = vadd.f32 %v3347_v14, %v3964_v56 }
 0x2e1   :  { %v1605_v20 = vadd.f32 %v3347_v14, %v3965_v61  ;;  %v2053_v49 = vcombine.low %v2045_v58, %v2052_v39  ;;  %v1822_v4 = vcombine.low %v1543_v52, %v1544_v32  ;;  %v3966_v21 = vrot.slane %v3249_v10, %v3121_v43 }
 0x2e2   :  { %v1823_v9 = vcombine.low %v1545_v54, %v1546_v55  ;;  %v2069_v24 = vrot.slane %v2055_v1, %v3141_v53  ;;  %v3967_v40 = vrot.slane %v3249_v10, %v3126_v47  ;;  %v3968_v46 = vrot.slane %v3109_v26, %v3129_v48  ;;  %2216 = vperm.xlu1 %2694, %v1845_v28  }
 0x2e3   :  { %v1606_v11 = vadd.f32 %v3347_v14, %v3966_v21  ;;  %v2095_v25 = vcombine.low %v1604_v12, %v1605_v20  ;;  %2258 = vperm.xlu0 %2693, %v2053_v49   ;;  %v1830_v45 = vrot.slane %v1822_v4, %v3141_v53  ;;  %v3969_v7 = vrot.slane %v3249_v10, %v3129_v48 }
 0x2e4   :  { %v1607_v41 = vadd.f32 %v3347_v14, %v3967_v40  ;;  %v1560_v63 = vadd.f32 %v3347_v14, %v3968_v46  ;;  %v1837_v16 = vrot.slane %v1823_v9, %v3141_v53  ;;  %v3970_v6 = vrot.slane %v3249_v10, %v3132_v2 }
 0x2e5   :  { %v1608_v57 = vadd.f32 %v3347_v14, %v3969_v7  ;;  %v2070_v27 = vcombine.low %v2062_v19, %v2069_v24  ;;  %v2103_v58 = vrot.slane %v2095_v25, %v3141_v53  ;;  %v3971_v60 = vrot.slane %v3275_v0, %v3121_v43 }
 0x2e6   :  { %v1609_v15 = vadd.f32 %v3347_v14, %v3970_v6  ;;  %v2096_v26 = vcombine.low %v1606_v11, %v1607_v41  ;;  %v1903_v59 = vrot.slane %v1560_v63, %v3141_v53  ;;  %v1838_v18 = vcombine.low %v1830_v45, %v1837_v16 }
 0x2e7   :  { %v1610_v29 = vadd.f32 %v3347_v14, %v3971_v60  ;;  %v3972_v17 = vrot.slane %v3275_v0, %v3126_v47  ;;  %v3973_v31 = vrot.slane %v3105_v51, %v3129_v48  ;;  %v3974_v39 = vrot.slane %v3105_v51, %v3132_v2  ;;  %2261 = vperm.xlu0 %2693, %v2070_v27  }
 0x2e8   :  { %v2112_v34 = vcombine.low %v1608_v57, %v1609_v15  ;;  %v2110_v28 = vrot.slane %v2096_v26, %v3141_v53  ;;  %v3975_v32 = vrot.slane %v3107_v22, %v3121_v43  ;;  %v3976_v55 = vrot.slane %v3107_v22, %v3126_v47  ;;  %2213 = vperm.xlu1 %2694, %v1838_v18  }
 0x2e9   :  { %v1611_v10 = vadd.f32 %v3347_v14, %v3972_v17  ;;  %v1552_v52 = vadd.f32 %v3347_v14, %v3973_v31  ;;  %v1553_v30 = vadd.f32 %v3347_v14, %v3974_v39  ;;  %v3977_v19 = vrot.slane %v3285_v5, %v3132_v2 }
 0x2ea   :  { %v1554_v50 = vadd.f32 %v3347_v14, %v3975_v32  ;;  %v2120_v23 = vrot.slane %v2112_v34, %v3141_v53  ;;  %v1555_v1 = vadd.f32 %v3347_v14, %v3976_v55  ;;  %v2111_v56 = vcombine.low %v2103_v58, %v2110_v28 }
 0x2eb   :  { %v2113_v54 = vcombine.low %v1610_v29, %v1611_v10  ;;  %v1617_v51 = vadd.f32 %v3347_v14, %v3977_v19  ;;  %v1863_v12 = vcombine.low %v1552_v52, %v1553_v30  ;;  %v3978_v61 = vrot.slane %v3311_v62, %v3121_v43 }
 0x2ec   :  { %v3979_v49 = vrot.slane %v3311_v62, %v3126_v47  ;;  %v1864_v9 = vcombine.low %v1554_v50, %v1555_v1  ;;  %v3980_v21 = vrot.slane %v3311_v62, %v3129_v48  ;;  %v3981_v24 = vrot.slane %v3111_v33, %v3132_v2  ;;  %2270 = vperm.xlu0 %2693, %v2111_v56  }
 0x2ed   :  { %v1618_v20 = vadd.f32 %v3347_v14, %v3978_v61  ;;  %v2127_v4 = vrot.slane %v2113_v54, %v3141_v53  ;;  %v1871_v41 = vrot.slane %v1863_v12, %v3141_v53  ;;  %v3982_v46 = vrot.slane %v3116_v36, %v3121_v43  ;;  %2228 = vperm.xlu1 %2694, %v1903_v59  }
 0x2ee   :  { %v1619_v22 = vadd.f32 %v3347_v14, %v3979_v49  ;;  %v1620_v11 = vadd.f32 %v3347_v14, %v3980_v21  ;;  %v1565_v40 = vadd.f32 %v3347_v14, %v3981_v24  ;;  %v3983_v45 = vrot.slane %v3116_v36, %v3126_v47 }
 0x2ef   :  { %v2153_v25 = vcombine.low %v1617_v51, %v1618_v20  ;;  %v1566_v63 = vadd.f32 %v3347_v14, %v3982_v46  ;;  %v1400_v7 = vrot.slane %v3321_v37, %v3129_v48  ;;  %v1878_v33 = vrot.slane %v1864_v9, %v3141_v53 }
 0x2f0   :  { %v1567_v16 = vadd.f32 %v3347_v14, %v3983_v45  ;;  %v2154_v57 = vcombine.low %v1619_v22, %v1620_v11  ;;  %v3984_v6 = vrot.slane %v3116_v36, %v3129_v48  ;;  %v2128_v27 = vcombine.low %v2120_v23, %v2127_v4 }
 0x2f1   :  { %v1921_v26 = vcombine.low %v1565_v40, %v1566_v63  ;;  %v3985_v58 = vrot.slane %v3311_v62, %v3132_v2  ;;  %v3986_v60 = vrot.slane %v3321_v37, %v3121_v43  ;;  %v2161_v17 = vrot.slane %v2153_v25, %v3141_v53 }
 0x2f2   :  { %v1568_v15 = vadd.f32 %v3347_v14, %v3984_v6  ;;  %v2168_v10 = vrot.slane %v2154_v57, %v3141_v53  ;;  %v3987_v59 = vrot.slane %v3321_v37, %v3126_v47  ;;  %v1879_v28 = vcombine.low %v1871_v41, %v1878_v33  ;;  %2273 = vperm.xlu0 %2693, %v2128_v27  }
 0x2f3   :  { %v1621_v18 = vadd.f32 %v3347_v14, %v3985_v58  ;;  %v1622_v29 = vadd.f32 %v3347_v14, %v3986_v60  ;;  %v1929_v62 = vrot.slane %v1921_v26, %v3141_v53  ;;  %v1624_v31 = vadd.f32 %v3347_v14, %v1400_v7 }
 0x2f4   :  { %v1922_v36 = vcombine.low %v1567_v16, %v1568_v15  ;;  %v1623_v34 = vadd.f32 %v3347_v14, %v3987_v59  ;;  %v3988_v30 = vrot.slane %v3118_v42, %v3132_v2  ;;  %v3989_v50 = vrot.slane %v3123_v44, %v3121_v43  ;;  %2222 = vperm.xlu1 %2694, %v1879_v28  }
 0x2f5   :  { %v2170_v52 = vcombine.low %v1621_v18, %v1622_v29  ;;  %v3990_v23 = vrot.slane %v3123_v44, %v3126_v47  ;;  %v1246_v1 = vrot.slane %v3239_v13, %v3121_v43  ;;  %v1253_v19 = vrot.slane %v3239_v13, %v3126_v47 }
 0x2f6   :  { %v1936_v39 = vrot.slane %v1922_v36, %v3141_v53  ;;  %v1573_v32 = vadd.f32 %v3347_v14, %v3988_v30  ;;  %v1574_v54 = vadd.f32 %v3347_v14, %v3989_v50  ;;  %v2171_v42 = vcombine.low %v1623_v34, %v1624_v31 }
 0x2f7   :  { %v1575_v55 = vadd.f32 %v3347_v14, %v3990_v23  ;;  %v3991_v51 = vrot.slane %v3123_v44, %v3129_v48  ;;  %v2169_v12 = vcombine.low %v2161_v17, %v2168_v10  ;;  %v2178_v61 = vrot.slane %v2170_v52, %v3141_v53 }
 0x2f8   :  { %v3992_v20 = vrot.slane %v3123_v44, %v3132_v2  ;;  %v1316_v4 = vrot.slane %v3275_v0, %v3129_v48  ;;  %v1323_v13 = vrot.slane %v3275_v0, %v3132_v2  ;;  %v1937_v9 = vcombine.low %v1929_v62, %v1936_v39 }
 0x2f9   :  { %v1576_v56 = vadd.f32 %v3347_v14, %v3991_v51  ;;  %v1962_v22 = vcombine.low %v1574_v54, %v1575_v55  ;;  %v2185_v21 = vrot.slane %v2171_v42, %v3141_v53  ;;  %v1330_v11 = vrot.slane %v3285_v5, %v3121_v43  ;;  %2282 = vperm.xlu0 %2693, %v2169_v12  }
 0x2fa   :  { %v1577_v49 = vadd.f32 %v3347_v14, %v3992_v20  ;;  %v1337_v24 = vrot.slane %v3285_v5, %v3126_v47  ;;  %v1961_v44 = vrot.slane %v1573_v32, %v3141_v53  ;;  %2234 = vperm.xlu1 %2694, %v1937_v9   ;;  %v3993_v41 = vrot.slane %v3167_v3, %v3126_v47 }
 0x2fb   :  { %v3994_v0 = vrot.slane %v3167_v3, %v3129_v48  ;;  %v3995_v63 = vrot.slane %v3167_v3, %v3132_v2  ;;  %v3996_v16 = vrot.slane %v3213_v38, %v3129_v48  ;;  %v2186_v33 = vcombine.low %v2178_v61, %v2185_v21 }
 0x2fc   :  { %v1963_v40 = vcombine.low %v1576_v56, %v1577_v49  ;;  %v1587_v25 = vadd.f32 %v3347_v14, %v3993_v41  ;;  %v1970_v57 = vrot.slane %v1962_v22, %v3141_v53  ;;  %v3997_v6 = vrot.slane %v3213_v38, %v3132_v2 }
 0x2fd   :  { %v1588_v46 = vadd.f32 %v3347_v14, %v3994_v0  ;;  %v1589_v45 = vadd.f32 %v3347_v14, %v3995_v63  ;;  %v1600_v7 = vadd.f32 %v3347_v14, %v3996_v16  ;;  %v1602_v27 = vadd.f32 %v3347_v14, %v1246_v1  ;;  %2285 = vperm.xlu0 %2693, %v2186_v33  }
 0x2fe   :  { %v1601_v15 = vadd.f32 %v3347_v14, %v3997_v6  ;;  %v1977_v26 = vrot.slane %v1963_v40, %v3141_v53  ;;  %v3998_v58 = vrot.slane %v3177_v8, %v3121_v43  ;;  %v1603_v60 = vadd.f32 %v3347_v14, %v1253_v19  ;;  %2240 = vperm.xlu1 %2694, %v1961_v44  }
 0x2ff   :  { %v1612_v29 = vadd.f32 %v3347_v14, %v1316_v4  ;;  %v1134_v17 = vrot.slane %v3167_v3, %v3121_v43  ;;  %v1344_v10 = vrot.slane %v3285_v5, %v3129_v48  ;;  %v1613_v59 = vadd.f32 %v3347_v14, %v1323_v13 }
 0x300   :  { %v1590_v18 = vadd.f32 %v3347_v14, %v3998_v58  ;;  %v2078_v36 = vcombine.low %v1600_v7, %v1601_v15  ;;  %v2079_v34 = vcombine.low %v1602_v27, %v1603_v60  ;;  %v1614_v28 = vadd.f32 %v3347_v14, %v1330_v11 }
 0x301   :  { %v2135_v8 = vrot.slane %v1612_v29, %v3141_v53  ;;  %v1615_v62 = vadd.f32 %v3347_v14, %v1337_v24  ;;  %v1586_v31 = vadd.f32 %v3347_v14, %v1134_v17  ;;  %v2020_v52 = vcombine.low %v1587_v25, %v1588_v46 }
 0x302   :  { %v2086_v43 = vrot.slane %v2078_v36, %v3141_v53  ;;  %v1616_v3 = vadd.f32 %v3347_v14, %v1344_v10  ;;  %v1978_v48 = vcombine.low %v1970_v57, %v1977_v26  ;;  %v2021_v5 = vcombine.low %v1589_v45, %v1590_v18 }
 0x303   :  { %v2093_v39 = vrot.slane %v2079_v34, %v3141_v53  ;;  %v2136_v30 = vcombine.low %v1613_v59, %v1614_v28  ;;  %v2019_v55 = vrot.slane %v1586_v31, %v3141_v53  ;;  %v2028_v1 = vrot.slane %v2020_v52, %v3141_v53 }
 0x304   :  { %v2137_v32 = vcombine.low %v1615_v62, %v1616_v3  ;;  %2243 = vperm.xlu1 %2694, %v1978_v48   ;;  %v2035_v19 = vrot.slane %v2021_v5, %v3141_v53  ;;  %v1225_v51 = vrot.slane %v3213_v38, %v3126_v47  ;;  %v1407_v20 = vrot.slane %v3321_v37, %v3132_v2 }
 0x305   :  { %v2094_v50 = vcombine.low %v2086_v43, %v2093_v39  ;;  %v2144_v54 = vrot.slane %v2136_v30, %v3141_v53  ;;  %v3999_v47 = vlaneseq }
 0x306   :  { %v2151_v23 = vrot.slane %v2137_v32, %v3141_v53  ;;  %v2036_v56 = vcombine.low %v2028_v1, %v2035_v19  ;;  %v1599_v12 = vadd.f32 %v3347_v14, %v1225_v51  ;;  %v1625_v49 = vadd.f32 %v3347_v14, %v1407_v20 }
 0x307   :  { %v2291_v38 = vand.u32 127, %v3999_v47 }
 0x308   :  { %v2152_v42 = vcombine.low %v2144_v54, %v2151_v23  ;;  %2252 = vperm.xlu1 %2694, %v2019_v55   ;;  %v2077_v61 = vrot.slane %v1599_v12, %v3141_v53  ;;  %v2193_v22 = vrot.slane %v1625_v49, %v3141_v53 }
 0x309   :  { %v2296_v4 = vadd.s32 4294967288, %v2291_v38  ;;  %v3812_v9 = vsub.s32 %v2291_v38, %v3114_v35  ;;  %v2303_v60 = vadd.s32 4294967280, %v2291_v38  ;;  %v2310_v10 = vadd.s32 4294967272, %v2291_v38 }
 0x30b   :  { %v3815_v21 = vsub.s32 %v2296_v4, %v3114_v35  ;;  %v3835_v36 = vsub.s32 %v2303_v60, %v3114_v35 }
 0x30c   :  { %2255 = vperm.xlu1 %2694, %v2036_v56  }
 0x310   :  { %2264 = vperm.xlu1 %2694, %v2077_v61  }
 0x314   :  { %2267 = vperm.xlu1 %2694, %v2094_v50  }
 0x318   :  { %2276 = vperm.xlu1 %2694, %v2135_v8   ;;  %v3841_v8 = vsub.s32 %v2310_v10, %v3114_v35 }
 0x31c   :  { %2279 = vperm.xlu1 %2694, %v2152_v42  }
 0x320   :  { %2288 = vperm.xlu1 %2694, %v2193_v22  }
 0x340   :  { %v2220_v37 = vpop.permute.xlu0 %2219 }
 0x341   :  { %v2196_v13 = vpop.permute.xlu1 %2195  ;;  %v2339_v52 = vrot.slane %v2220_v37, %v3812_v9 }
 0x342   :  { %v2295_v2 = vrot.slane %v2196_v13, %v3812_v9 }
 0x344   :  { %v2226_v40 = vpop.permute.xlu0 %2225 }
 0x345   :  { %v2348_v43 = vrot.slane %v2226_v40, %v3835_v36 }
 0x346   :  { %v2199_v11 = vpop.permute.xlu1 %2198 }
 0x347   :  { %v2300_v14 = vrot.slane %v2199_v11, %v3815_v21 }
 0x348   :  { %v2232_v25 = vpop.permute.xlu0 %2231 }
 0x349   :  { %v2302_v53 = vsel %vm2301_vm3, %v2300_v14, %v2295_v2  ;;  %v2358_v35 = vrot.slane %v2232_v25, %v3812_v9 }
 0x34a   :  { %v2205_v24 = vpop.permute.xlu1 %2204 }
 0x34b   :  { %v2314_v39 = vrot.slane %v2205_v24, %v3841_v8 }
 0x34d   :  { %v3822_v63 = vpop.permute.xlu0 %2237 }
 0x34e   :  { %v2367_v50 = vrot.slane %v3822_v63, %v3835_v36 }
 0x350   :  { %v2202_v44 = vpop.permute.xlu1 %2201 }
 0x351   :  { %v2307_v59 = vrot.slane %v2202_v44, %v3835_v36 }
 0x353   :  { %v2309_v3 = vsel %vm2308_vm4, %v2307_v59, %v2302_v53 }
 0x354   :  { %v2247_v16 = vpop.permute.xlu0 %2246  ;;  %v2316_v1 = vsel %vm2315_vm5, %v2314_v39, %v2309_v3 }
 0x355   :  { %v2381_v54 = vrot.slane %v2247_v16, %v3815_v21 }
 0x357   :  { %v2208_v41 = vpop.permute.xlu1 %2207 }
 0x358   :  { %v2320_v30 = vrot.slane %v2208_v41, %v3812_v9 }
 0x35a   :  { %v3826_v57 = vpop.permute.xlu0 %2249 }
 0x35b   :  { %v2386_v19 = vrot.slane %v3826_v57, %v3835_v36 }
 0x35d   :  { %v2211_v0 = vpop.permute.xlu1 %2210 }
 0x35e   :  { %v2324_v31 = vrot.slane %v2211_v0, %v3815_v21 }
 0x360   :  { %v2325_v42 = vsel %vm2301_vm3, %v2324_v31, %v2320_v30 }
 0x361   :  { %v3820_v46 = vpop.permute.xlu1 %2216 }
 0x362   :  { %v2259_v15 = vpop.permute.xlu0 %2258  ;;  %v2334_v61 = vrot.slane %v3820_v46, %v3841_v8 }
 0x363   :  { %v2400_v12 = vrot.slane %v2259_v15, %v3815_v21 }
 0x366   :  { %v3830_v58 = vpop.permute.xlu0 %2261 }
 0x367   :  { %v2214_v45 = vpop.permute.xlu1 %2213  ;;  %v2405_v47 = vrot.slane %v3830_v58, %v3835_v36 }
 0x368   :  { %v2329_v48 = vrot.slane %v2214_v45, %v3835_v36 }
 0x36a   :  { %v2330_v20 = vsel %vm2308_vm4, %v2329_v48, %v2325_v42 }
 0x36b   :  { %v2271_v29 = vpop.permute.xlu0 %2270  ;;  %v2335_v53 = vsel %vm2315_vm5, %v2334_v61, %v2330_v20 }
 0x36c   :  { %v3824_v7 = vpop.permute.xlu1 %2228  ;;  %v2419_v11 = vrot.slane %v2271_v29, %v3815_v21 }
 0x36d   :  { %v2353_v2 = vrot.slane %v3824_v7, %v3841_v8 }
 0x371   :  { %v2274_v28 = vpop.permute.xlu0 %2273 }
 0x372   :  { %v2424_v24 = vrot.slane %v2274_v28, %v3835_v36 }
 0x373   :  { %v2223_v33 = vpop.permute.xlu1 %2222 }
 0x374   :  { %v2343_v62 = vrot.slane %v2223_v33, %v3815_v21 }
 0x376   :  { %v2344_v23 = vsel %vm2301_vm3, %v2343_v62, %v2339_v52 }
 0x377   :  { %v2349_v38 = vsel %vm2308_vm4, %v2348_v43, %v2344_v23 }
 0x378   :  { %v2283_v51 = vpop.permute.xlu0 %2282  ;;  %v2354_v41 = vsel %vm2315_vm5, %v2353_v2, %v2349_v38 }
 0x379   :  { %v2235_v6 = vpop.permute.xlu1 %2234  ;;  %v2438_v45 = vrot.slane %v2283_v51, %v3815_v21 }
 0x37a   :  { %v2362_v32 = vrot.slane %v2235_v6, %v3815_v21  ;;  %v2451_v6 = vsel %vm2450_vm6, %v2335_v53, %v2316_v1 }
 0x37c   :  { %v2363_v4 = vsel %vm2301_vm3, %v2362_v32, %v2358_v35  ;;  %v2286_v16 = vpop.permute.xlu0 %2285 }
 0x37d   :  { %v3828_v27 = vpop.permute.xlu1 %2240  ;;  %v2368_v25 = vsel %vm2308_vm4, %v2367_v50, %v2363_v4  ;;  %v2443_v60 = vrot.slane %v2286_v16, %v3835_v36 }
 0x37e   :  { %v2372_v13 = vrot.slane %v3828_v27, %v3841_v8 }
 0x380   :  { %v2373_v7 = vsel %vm2315_vm5, %v2372_v13, %v2368_v25 }
 0x383   :  { %v2244_v26 = vpop.permute.xlu1 %2243 }
 0x384   :  { %v2377_v55 = vrot.slane %v2244_v26, %v3812_v9  ;;  %v2453_v26 = vsel %vm2452_vm7, %v2354_v41, %v2451_v6 }
 0x385   :  { %v2455_v29 = vsel %vm2454_vm8, %v2373_v7, %v2453_v26 }
 0x386   :  { %v2382_v14 = vsel %vm2301_vm3, %v2381_v54, %v2377_v55 }
 0x387   :  { %v3832_v18 = vpop.permute.xlu1 %2252  ;;  %v2387_v33 = vsel %vm2308_vm4, %v2386_v19, %v2382_v14 }
 0x388   :  { %v2391_v37 = vrot.slane %v3832_v18, %v3841_v8 }
 0x38a   :  { %v2392_v15 = vsel %vm2315_vm5, %v2391_v37, %v2387_v33 }
 0x38b   :  { %v2256_v17 = vpop.permute.xlu1 %2255  ;;  %v2457_v10 = vsel %vm2456_vm9, %v2392_v15, %v2455_v29 }
 0x38c   :  { %v2396_v56 = vrot.slane %v2256_v17, %v3812_v9 }
 0x38e   :  { %v2401_v44 = vsel %vm2301_vm3, %v2400_v12, %v2396_v56 }
 0x38f   :  { %v3838_v34 = vpop.permute.xlu1 %2264  ;;  %v2406_v27 = vsel %vm2308_vm4, %v2405_v47, %v2401_v44 }
 0x390   :  { %v2410_v40 = vrot.slane %v3838_v34, %v3841_v8 }
 0x392   :  { %v2411_v58 = vsel %vm2315_vm5, %v2410_v40, %v2406_v27 }
 0x393   :  { %v2268_v5 = vpop.permute.xlu1 %2267  ;;  %v2459_v28 = vsel %vm2458_vm10, %v2411_v58, %v2457_v10 }
 0x394   :  { %v2415_v49 = vrot.slane %v2268_v5, %v3812_v9 }
 0x396   :  { %v2420_v0 = vsel %vm2301_vm3, %v2419_v11, %v2415_v49 }
 0x397   :  { %v2277_v22 = vpop.permute.xlu1 %2276  ;;  %v2425_v21 = vsel %vm2308_vm4, %v2424_v24, %v2420_v0 }
 0x398   :  { %v2429_v46 = vrot.slane %v2277_v22, %v3841_v8 }
 0x39b   :  { %v2280_v63 = vpop.permute.xlu1 %2279 }
 0x39c   :  { %v2434_v57 = vrot.slane %v2280_v63, %v3812_v9  ;;  %v2430_v9 = vsel %vm2315_vm5, %v2429_v46, %v2425_v21 }
 0x39d   :  { %v2461_v62 = vsel %vm2460_vm11, %v2430_v9, %v2459_v28 }
 0x39e   :  { %v2439_v18 = vsel %vm2301_vm3, %v2438_v45, %v2434_v57 }
 0x39f   :  { %v2289_v17 = vpop.permute.xlu1 %2288  ;;  %v2444_v34 = vsel %vm2308_vm4, %v2443_v60, %v2439_v18 }
 0x3a0   :  { %v2448_v59 = vrot.slane %v2289_v17, %v3841_v8 }
 0x3a2   :  { %v2449_v36 = vsel %vm2315_vm5, %v2448_v59, %v2444_v34 }
 0x3a3   :  { %v2463_v31 = vsel %vm2462_vm12, %v2449_v36, %v2461_v62 }
 0x3a4   :  { %2466 = vst.msk [vmem:[#allocation3] sm:$0xff] %vm2465_vm13, %v2463_v31 }
 0x3a5   :  { %2716 = shalt.err (!%p2713_p4)
}
 0x3a6   :  { %s2717_s29 = scalar_lea.hbm %s3927_s7, 128 }
 0x3a7   :  { %p2718_p5 = scmp.ne.s32.totalorder %s3927_s7, %s2717_s29  ;;  %p2721_p6 = scmp.lt.u32.totalorder %s2717_s29, %s3927_s7 }
 0x3a9   :  { %p2723_p7 = pnand %p2721_p6, %p2718_p5 }
 0x3ab   :  { %2726 = shalt.err (!%p2723_p7)
}
 0x3ac   :  { %2476 = dma.vmem_to_hbm [thread:$0]  %s2474_s5, 128, %s3927_s7, [#allocation4]  }
 0x3ad   :  { %2727 = dma.done.wait [#allocation4], 128  }
 0x3ae   :  { %2728 = vsyncadd [#allocation4], 4294967168 }
 0x3af   :  { %2480 = vsyncpa [#allocation4], 1 }

</bundles_post_ra>
